<compile_context>
chip_gen: v5e
topology: v5e:2x2
jax: 0.10.0
libtpu: 0.0.40
codegen_flags: <defaults>
</compile_context>

<pallas_src>
import functools

import jax
import jax.numpy as jnp
from jax.experimental import pallas as pl
from jax.experimental.pallas import tpu as pltpu

LANE = 128


def _round_up(n, m):
    return ((n + m - 1) // m) * m


def _pad_axis(a, target, axis):
    pad = target - a.shape[axis]
    if pad <= 0:
        return a
    widths = [(0, 0)] * a.ndim
    widths[axis] = (0, pad)
    return jnp.pad(a, widths)


def _build_banded_conv(conv_w, W, cpad):
    """Fold a KHxKW conv into KH block-banded matrices.

    Returns band[kh] of shape (Wp*Cin, W*cpad) with
        band[kh][(w+kw)*Cin + c, w*cpad + co] = conv_w[kh, kw, c, co]
    so that (row of SAME-padded, lane-dense input) @ band[kh], summed over kh,
    equals the conv output for that image row, laid out as (w, co) on the lanes.
    TODO(synk): in production cache these (they only depend on the weights).
    """
    KH, KW, Cin, Cout = conv_w.shape
    wp = W + KW - 1
    eye_w = jnp.eye(W, dtype=conv_w.dtype)
    mats = []
    for kh in range(KH):
        acc = jnp.zeros((wp * Cin, W * Cout), conv_w.dtype)
        for kw in range(KW):
            blk = jnp.kron(eye_w, conv_w[kh, kw])          # (W*Cin, W*Cout)
            acc = acc + jnp.pad(blk, ((kw * Cin, (KW - 1 - kw) * Cin), (0, 0)))
        mats.append(acc)
    band = jnp.stack(mats)                                  # (KH, wp*Cin, W*Cout)
    band = band.reshape(KH, wp * Cin, W, Cout)
    band = jnp.pad(band, ((0, 0), (0, 0), (0, 0), (0, cpad - Cout)))
    return band.reshape(KH, wp * Cin, W * cpad).astype(jnp.bfloat16)


def _pick_batch_tile(B, max_tb=32):
    """Largest divisor of B that keeps >=2 grid steps (v7x megacore) and a modest tile."""
    if B <= 1:
        return 1
    tb = 1
    for cand in range(1, min(B, max_tb) + 1):
        if B % cand == 0 and B // cand >= 2:
            tb = cand
    return tb


def _pick_row_chunk(H, TB, lane_width, budget_bytes=2 << 20):
    """Chunk image rows so the (TB*chunk, lane_width) f32 conv intermediate stays bounded."""
    rows = max(8, budget_bytes // (lane_width * 4 * max(TB, 1)))
    ch = min(H, rows)
    if TB > 1:
        ch = max(8, (ch // 8) * 8)   # keep the (TB*ch)->(TB,ch) regroup tile-aligned
    return min(ch, H)


# ----------------------------------------------------------------------------
# Fused kernel: banded-matmul 3x3 conv + bias + ReLU + global avg pool + MLP
# ----------------------------------------------------------------------------
def seq2seq_kernel(x_ref, band_ref, bct_ref, w1_ref, b1_ref, w2_ref, b2_ref,
                   o_ref, *, H, W, KH, row_chunk):
    # x_ref    : (TB, Hp, Wp*Cin)      SAME-padded, lane-dense input rows (f32)
    # band_ref : (KH, Wp*Cin, W*Cpad)  banded conv weights (bf16)
    # bct_ref  : (1, W*Cpad)           conv bias tiled per output column (f32)
    # w1_ref   : (Cpad, Hpad) bf16   b1_ref : (1, Hpad) f32
    # w2_ref   : (Hpad, Spad) bf16   b2_ref : (1, Spad) f32
    # o_ref    : (1, TB, Spad)         lane-dense output tile (f32)
    TB = x_ref.shape[0]
    WpC = x_ref.shape[2]
    WCp = band_ref.shape[2]
    Cpad = w1_ref.shape[0]

    bct = bct_ref[...]                 # hoisted: loaded once per grid step

    # Conv + bias + ReLU + pooling streamed over chunks of image rows so the
    # (rows, W*Cpad) f32 intermediate stays bounded as TB grows.
    pooled = jnp.zeros((TB, WCp), jnp.float32)
    n_chunks = -(-H // row_chunk)
    for ci in range(n_chunks):
        h0 = ci * row_chunk
        ch = min(row_chunk, H - h0)
        rows = TB * ch
        y = None
        for kh in range(KH):
            # Plain row slice + leading-dim merge (minor dim untouched -> no relayout).
            a = x_ref[:, h0 + kh:h0 + kh + ch, :].reshape(rows, WpC)
            t = jnp.dot(a.astype(jnp.bfloat16), band_ref[kh],
                        preferred_element_type=jnp.float32)     # (rows, W*Cpad)
            y = t if y is None else y + t
        y = jnp.maximum(y + bct, 0.0)                            # bias + ReLU (f32 VPU)
        pooled = pooled + jnp.sum(y.reshape(TB, ch, WCp), axis=1)

    # Finish AdaptiveAvgPool2d(1): fold the W lane-groups (128-aligned slices) + scale.
    c = pooled[:, 0:Cpad]
    for w in range(1, W):
        c = c + pooled[:, w * Cpad:(w + 1) * Cpad]
    c = c * (1.0 / (H * W))            # == PyTorch `c.squeeze()`: (TB, Cout) in lanes

    # Decoder MLP: Linear -> ReLU -> Linear, all lane-dense (128 wide).
    h1 = jnp.dot(c.astype(jnp.bfloat16), w1_ref[...],
                 preferred_element_type=jnp.float32) + b1_ref[...]
    h1 = jnp.maximum(h1, 0.0)
    o_ref[0] = jnp.dot(h1.astype(jnp.bfloat16), w2_ref[...],
                       preferred_element_type=jnp.float32) + b2_ref[...]


# ----------------------------------------------------------------------------
# Wrapper (layout, lane padding, pallas_call plumbing)
# ----------------------------------------------------------------------------
@jax.jit
def seq2seq_forward(x_nchw, params):
    conv_w, conv_b, w1, b1, w2, b2 = (params[k] for k in
                                      ("conv_w", "conv_b", "w1", "b1", "w2", "b2"))
    B, Cin, H, W = x_nchw.shape
    KH, KW, _, Cout = conv_w.shape
    Hid = w1.shape[1]
    Sout = w2.shape[1]

    Cpad = _round_up(Cout, LANE)
    Hpad = _round_up(Hid, LANE)
    Spad = _round_up(Sout, LANE)
    ph, pw = KH // 2, KW // 2
    Hp, Wp = H + 2 * ph, W + 2 * pw

    # NCHW (PyTorch) -> channels-last, lane-dense rows, SAME halo folded into the same
    # copy.  Activations kept f32 so every row-offset slice in the kernel stays on the
    # unpacked path.  TODO(synk): at production sizes do the halo in-kernel (zero-filled
    # VMEM staging) or use allow_input_fusion, and carry activations in bf16.
    x_nhwc = jnp.transpose(x_nchw, (0, 2, 3, 1)).astype(jnp.float32)
    x_pad = jnp.pad(x_nhwc, ((0, 0), (ph, ph), (pw, pw), (0, 0))).reshape(B, Hp, Wp * Cin)

    # Weights: banded conv matrices (bf16), lane-padded decoder weights (bf16),
    # f32 biases (padded lanes stay exactly zero through bias / ReLU / matmuls).
    band = _build_banded_conv(conv_w, W, Cpad)                     # (KH, Wp*Cin, W*Cpad)
    bc_pad = _pad_axis(conv_b.reshape(1, Cout).astype(jnp.float32), Cpad, 1)
    bct = jnp.tile(bc_pad, (1, W))                                 # (1, W*Cpad)
    w1p = _pad_axis(_pad_axis(w1, Cpad, 0), Hpad, 1).astype(jnp.bfloat16)
    b1p = _pad_axis(b1.reshape(1, Hid).astype(jnp.float32), Hpad, 1)
    w2p = _pad_axis(_pad_axis(w2, Hpad, 0), Spad, 1).astype(jnp.bfloat16)
    b2p = _pad_axis(b2.reshape(1, Sout).astype(jnp.float32), Spad, 1)

    # Batch tiling: divisor-based TB (no giant fallback tile), >=2 "parallel" steps
    # so the grid can shard across both v7x TensorCores.
    TB = _pick_batch_tile(B)
    assert B % TB == 0
    G = B // TB
    row_chunk = _pick_row_chunk(H, TB, W * Cpad)

    kernel = functools.partial(seq2seq_kernel, H=H, W=W, KH=KH, row_chunk=row_chunk)

    out_pad = pl.pallas_call(
        kernel,
        out_shape=jax.ShapeDtypeStruct((G, TB, Spad), jnp.float32),
        grid=(G,),
        in_specs=[
            pl.BlockSpec((TB, Hp, Wp * Cin), lambda i: (i, 0, 0)),
            pl.BlockSpec((KH, Wp * Cin, W * Cpad), lambda i: (0, 0, 0)),
            pl.BlockSpec((1, W * Cpad), lambda i: (0, 0)),
            pl.BlockSpec((Cpad, Hpad), lambda i: (0, 0)),
            pl.BlockSpec((1, Hpad), lambda i: (0, 0)),
            pl.BlockSpec((Hpad, Spad), lambda i: (0, 0)),
            pl.BlockSpec((1, Spad), lambda i: (0, 0)),
        ],
        out_specs=pl.BlockSpec((1, TB, Spad), lambda i: (i, 0, 0)),
        compiler_params=pltpu.CompilerParams(
            dimension_semantics=("parallel",),
            # Explicit scoped-VMEM headroom (safe on v5e/v6e/v7x); raise toward
            # 96 MiB on v6e if TB is pushed much higher.
            vmem_limit_bytes=48 * 1024 * 1024),
    )(x_pad, band, bct, w1p, b1p, w2p, b2p)

    # Un-tile and slice the lane padding off the final output.
    return out_pad.reshape(B, Spad)[:, :Sout]


# ----------------------------------------------------------------------------
# Pure-JAX reference of the same forward pass (f32, for correctness check)
# ----------------------------------------------------------------------------
def seq2seq_reference(x_nchw, params):
    conv_w, conv_b, w1, b1, w2, b2 = (params[k] for k in
                                      ("conv_w", "conv_b", "w1", "b1", "w2", "b2"))
    x = jnp.transpose(x_nchw, (0, 2, 3, 1)).astype(jnp.float32)   # NHWC
    y = jax.lax.conv_general_dilated(
        x, conv_w, window_strides=(1, 1), padding="SAME",
        dimension_numbers=("NHWC", "HWIO", "NHWC"))
    y = jnp.maximum(y + conv_b.reshape(1, 1, 1, -1), 0.0)
    c = jnp.mean(y, axis=(1, 2))                                   # (B, Cout)
    h = jnp.maximum(c @ w1 + b1, 0.0)
    return h @ w2 + b2


# ----------------------------------------------------------------------------
# Main
# ----------------------------------------------------------------------------
if __name__ == "__main__":
    B, Cin, H, W = 2, 4, 16, 16      # input image batch (NCHW like PyTorch)
    Cout = 32                         # encoder channels / context size
    Hid = 64                          # decoder hidden
    Sout = 8                          # output sequence length

    key = jax.random.PRNGKey(0)
    k_x, k_cw, k_cb, k_w1, k_b1, k_w2, k_b2 = jax.random.split(key, 7)

    x = jax.random.normal(k_x, (B, Cin, H, W), dtype=jnp.float32)

    params = {
        "conv_w": 0.1 * jax.random.normal(k_cw, (3, 3, Cin, Cout), dtype=jnp.float32),
        "conv_b": 0.1 * jax.random.normal(k_cb, (1, Cout), dtype=jnp.float32),
        "w1": 0.1 * jax.random.normal(k_w1, (Cout, Hid), dtype=jnp.float32),
        "b1": 0.1 * jax.random.normal(k_b1, (1, Hid), dtype=jnp.float32),
        "w2": 0.1 * jax.random.normal(k_w2, (Hid, Sout), dtype=jnp.float32),
        "b2": 0.1 * jax.random.normal(k_b2, (1, Sout), dtype=jnp.float32),
    }

    out = jax.block_until_ready(seq2seq_forward(x, params))
    ref = jax.block_until_ready(seq2seq_reference(x, params))

    assert out.shape == (B, Sout), out.shape
    # bf16 MXU operands with f32 accumulation -> loosened tolerance vs f32 ref.
    assert jnp.allclose(out, ref, atol=2e-2, rtol=2e-2), \
        f"max abs err {jnp.max(jnp.abs(out - ref))}"

    print("KERNEL_OK")
</pallas_src>

<mosaic_0001>
module attributes {stable_mosaic.version = 11 : i64} {
  func.func @seq2seq_kernel(%arg0: i32, %arg1: memref<1x18x72xf32, #tpu.memory_space<vmem>>, %arg2: memref<3x72x2048xbf16, #tpu.memory_space<vmem>>, %arg3: memref<1x2048xf32, #tpu.memory_space<vmem>>, %arg4: memref<128x128xbf16, #tpu.memory_space<vmem>>, %arg5: memref<1x128xf32, #tpu.memory_space<vmem>>, %arg6: memref<128x128xbf16, #tpu.memory_space<vmem>>, %arg7: memref<1x128xf32, #tpu.memory_space<vmem>>, %arg8: memref<1x1x128xf32, #tpu.memory_space<vmem>>) attributes {dimension_semantics = [#tpu.dimension_semantics<parallel>], iteration_bounds = array<i64: 2>, scalar_prefetch = 0 : i64, scratch_operands = 0 : i64, tpu.core_type = #tpu.core_type<tc>, window_params = [{transform_indices = @transform_0, window_bounds = array<i64: 1, 18, 72>}, {pipeline_mode = #tpu.pipeline_mode<synchronous>, transform_indices = @transform_1, window_bounds = array<i64: 3, 72, 2048>}, {pipeline_mode = #tpu.pipeline_mode<synchronous>, transform_indices = @transform_2, window_bounds = array<i64: 1, 2048>}, {pipeline_mode = #tpu.pipeline_mode<synchronous>, transform_indices = @transform_3, window_bounds = array<i64: 128, 128>}, {pipeline_mode = #tpu.pipeline_mode<synchronous>, transform_indices = @transform_4, window_bounds = array<i64: 1, 128>}, {pipeline_mode = #tpu.pipeline_mode<synchronous>, transform_indices = @transform_5, window_bounds = array<i64: 128, 128>}, {pipeline_mode = #tpu.pipeline_mode<synchronous>, transform_indices = @transform_6, window_bounds = array<i64: 1, 128>}, {transform_indices = @transform_7, window_bounds = array<i64: 1, 1, 128>}]} {
    %c0 = arith.constant 0 : index
    %c0_0 = arith.constant 0 : index
    %0 = vector.load %arg3[%c0, %c0_0] : memref<1x2048xf32, #tpu.memory_space<vmem>>, vector<1x2048xf32>
    %cst = arith.constant 0.000000e+00 : f32
    %1 = vector.broadcast %cst : f32 to vector<1x2048xf32>
    %c0_1 = arith.constant 0 : index
    %c0_2 = arith.constant 0 : index
    %c0_3 = arith.constant 0 : index
    %2 = vector.load %arg1[%c0_1, %c0_2, %c0_3] : memref<1x18x72xf32, #tpu.memory_space<vmem>>, vector<1x16x72xf32>
    %3 = vector.shape_cast %2 : vector<1x16x72xf32> to vector<16x72xf32>
    %4 = arith.truncf %3 : vector<16x72xf32> to vector<16x72xbf16>
    %c0_4 = arith.constant 0 : index
    %c0_5 = arith.constant 0 : index
    %c0_6 = arith.constant 0 : index
    %5 = vector.load %arg2[%c0_4, %c0_5, %c0_6] : memref<3x72x2048xbf16, #tpu.memory_space<vmem>>, vector<1x72x2048xbf16>
    %6 = vector.shape_cast %5 : vector<1x72x2048xbf16> to vector<72x2048xbf16>
    %cst_7 = arith.constant dense<0.000000e+00> : vector<16x2048xf32>
    %7 = tpu.matmul %4, %6, %cst_7 {dimension_numbers = #tpu.dot_dimension_numbers<[1], [0], [0], [1], [0, 0, 1, 1], [], []>} : vector<16x72xbf16>, vector<72x2048xbf16>, vector<16x2048xf32> -> vector<16x2048xf32>
    %c0_8 = arith.constant 0 : index
    %c1 = arith.constant 1 : index
    %c0_9 = arith.constant 0 : index
    %8 = vector.load %arg1[%c0_8, %c1, %c0_9] : memref<1x18x72xf32, #tpu.memory_space<vmem>>, vector<1x16x72xf32>
    %9 = vector.shape_cast %8 : vector<1x16x72xf32> to vector<16x72xf32>
    %10 = arith.truncf %9 : vector<16x72xf32> to vector<16x72xbf16>
    %c1_10 = arith.constant 1 : index
    %c0_11 = arith.constant 0 : index
    %c0_12 = arith.constant 0 : index
    %11 = vector.load %arg2[%c1_10, %c0_11, %c0_12] : memref<3x72x2048xbf16, #tpu.memory_space<vmem>>, vector<1x72x2048xbf16>
    %12 = vector.shape_cast %11 : vector<1x72x2048xbf16> to vector<72x2048xbf16>
    %cst_13 = arith.constant dense<0.000000e+00> : vector<16x2048xf32>
    %13 = tpu.matmul %10, %12, %cst_13 {dimension_numbers = #tpu.dot_dimension_numbers<[1], [0], [0], [1], [0, 0, 1, 1], [], []>} : vector<16x72xbf16>, vector<72x2048xbf16>, vector<16x2048xf32> -> vector<16x2048xf32>
    %14 = arith.addf %7, %13 : vector<16x2048xf32>
    %c0_14 = arith.constant 0 : index
    %c2 = arith.constant 2 : index
    %c0_15 = arith.constant 0 : index
    %15 = vector.load %arg1[%c0_14, %c2, %c0_15] : memref<1x18x72xf32, #tpu.memory_space<vmem>>, vector<1x16x72xf32>
    %16 = vector.shape_cast %15 : vector<1x16x72xf32> to vector<16x72xf32>
    %17 = arith.truncf %16 : vector<16x72xf32> to vector<16x72xbf16>
    %c2_16 = arith.constant 2 : index
    %c0_17 = arith.constant 0 : index
    %c0_18 = arith.constant 0 : index
    %18 = vector.load %arg2[%c2_16, %c0_17, %c0_18] : memref<3x72x2048xbf16, #tpu.memory_space<vmem>>, vector<1x72x2048xbf16>
    %19 = vector.shape_cast %18 : vector<1x72x2048xbf16> to vector<72x2048xbf16>
    %cst_19 = arith.constant dense<0.000000e+00> : vector<16x2048xf32>
    %20 = tpu.matmul %17, %19, %cst_19 {dimension_numbers = #tpu.dot_dimension_numbers<[1], [0], [0], [1], [0, 0, 1, 1], [], []>} : vector<16x72xbf16>, vector<72x2048xbf16>, vector<16x2048xf32> -> vector<16x2048xf32>
    %21 = arith.addf %14, %20 : vector<16x2048xf32>
    %22 = vector.broadcast %0 : vector<1x2048xf32> to vector<16x2048xf32>
    %23 = arith.addf %21, %22 : vector<16x2048xf32>
    %cst_20 = arith.constant 0.000000e+00 : f32
    %24 = vector.broadcast %cst_20 : f32 to vector<16x2048xf32>
    %25 = arith.maximumf %23, %24 : vector<16x2048xf32>
    %26 = vector.shape_cast %25 : vector<16x2048xf32> to vector<1x16x2048xf32>
    %cst_21 = arith.constant dense<0.000000e+00> : vector<1x2048xf32>
    %27 = vector.multi_reduction <add>, %26, %cst_21 [1] : vector<1x16x2048xf32> to vector<1x2048xf32>
    %28 = arith.addf %1, %27 : vector<1x2048xf32>
    %29 = vector.extract_strided_slice %28 {offsets = [0, 0], sizes = [1, 128], strides = [1, 1]} : vector<1x2048xf32> to vector<1x128xf32>
    %30 = vector.extract_strided_slice %28 {offsets = [0, 128], sizes = [1, 128], strides = [1, 1]} : vector<1x2048xf32> to vector<1x128xf32>
    %31 = arith.addf %29, %30 : vector<1x128xf32>
    %32 = vector.extract_strided_slice %28 {offsets = [0, 256], sizes = [1, 128], strides = [1, 1]} : vector<1x2048xf32> to vector<1x128xf32>
    %33 = arith.addf %31, %32 : vector<1x128xf32>
    %34 = vector.extract_strided_slice %28 {offsets = [0, 384], sizes = [1, 128], strides = [1, 1]} : vector<1x2048xf32> to vector<1x128xf32>
    %35 = arith.addf %33, %34 : vector<1x128xf32>
    %36 = vector.extract_strided_slice %28 {offsets = [0, 512], sizes = [1, 128], strides = [1, 1]} : vector<1x2048xf32> to vector<1x128xf32>
    %37 = arith.addf %35, %36 : vector<1x128xf32>
    %38 = vector.extract_strided_slice %28 {offsets = [0, 640], sizes = [1, 128], strides = [1, 1]} : vector<1x2048xf32> to vector<1x128xf32>
    %39 = arith.addf %37, %38 : vector<1x128xf32>
    %40 = vector.extract_strided_slice %28 {offsets = [0, 768], sizes = [1, 128], strides = [1, 1]} : vector<1x2048xf32> to vector<1x128xf32>
    %41 = arith.addf %39, %40 : vector<1x128xf32>
    %42 = vector.extract_strided_slice %28 {offsets = [0, 896], sizes = [1, 128], strides = [1, 1]} : vector<1x2048xf32> to vector<1x128xf32>
    %43 = arith.addf %41, %42 : vector<1x128xf32>
    %44 = vector.extract_strided_slice %28 {offsets = [0, 1024], sizes = [1, 128], strides = [1, 1]} : vector<1x2048xf32> to vector<1x128xf32>
    %45 = arith.addf %43, %44 : vector<1x128xf32>
    %46 = vector.extract_strided_slice %28 {offsets = [0, 1152], sizes = [1, 128], strides = [1, 1]} : vector<1x2048xf32> to vector<1x128xf32>
    %47 = arith.addf %45, %46 : vector<1x128xf32>
    %48 = vector.extract_strided_slice %28 {offsets = [0, 1280], sizes = [1, 128], strides = [1, 1]} : vector<1x2048xf32> to vector<1x128xf32>
    %49 = arith.addf %47, %48 : vector<1x128xf32>
    %50 = vector.extract_strided_slice %28 {offsets = [0, 1408], sizes = [1, 128], strides = [1, 1]} : vector<1x2048xf32> to vector<1x128xf32>
    %51 = arith.addf %49, %50 : vector<1x128xf32>
    %52 = vector.extract_strided_slice %28 {offsets = [0, 1536], sizes = [1, 128], strides = [1, 1]} : vector<1x2048xf32> to vector<1x128xf32>
    %53 = arith.addf %51, %52 : vector<1x128xf32>
    %54 = vector.extract_strided_slice %28 {offsets = [0, 1664], sizes = [1, 128], strides = [1, 1]} : vector<1x2048xf32> to vector<1x128xf32>
    %55 = arith.addf %53, %54 : vector<1x128xf32>
    %56 = vector.extract_strided_slice %28 {offsets = [0, 1792], sizes = [1, 128], strides = [1, 1]} : vector<1x2048xf32> to vector<1x128xf32>
    %57 = arith.addf %55, %56 : vector<1x128xf32>
    %58 = vector.extract_strided_slice %28 {offsets = [0, 1920], sizes = [1, 128], strides = [1, 1]} : vector<1x2048xf32> to vector<1x128xf32>
    %59 = arith.addf %57, %58 : vector<1x128xf32>
    %cst_22 = arith.constant 3.906250e-03 : f32
    %60 = vector.broadcast %cst_22 : f32 to vector<1x128xf32>
    %61 = arith.mulf %59, %60 : vector<1x128xf32>
    %62 = arith.truncf %61 : vector<1x128xf32> to vector<1x128xbf16>
    %c0_23 = arith.constant 0 : index
    %c0_24 = arith.constant 0 : index
    %63 = vector.load %arg4[%c0_23, %c0_24] : memref<128x128xbf16, #tpu.memory_space<vmem>>, vector<128x128xbf16>
    %cst_25 = arith.constant dense<0.000000e+00> : vector<1x128xf32>
    %64 = tpu.matmul %62, %63, %cst_25 {dimension_numbers = #tpu.dot_dimension_numbers<[1], [0], [0], [1], [0, 0, 1, 1], [], []>} : vector<1x128xbf16>, vector<128x128xbf16>, vector<1x128xf32> -> vector<1x128xf32>
    %c0_26 = arith.constant 0 : index
    %c0_27 = arith.constant 0 : index
    %65 = vector.load %arg5[%c0_26, %c0_27] : memref<1x128xf32, #tpu.memory_space<vmem>>, vector<1x128xf32>
    %66 = arith.addf %64, %65 : vector<1x128xf32>
    %cst_28 = arith.constant 0.000000e+00 : f32
    %67 = vector.broadcast %cst_28 : f32 to vector<1x128xf32>
    %68 = arith.maximumf %66, %67 : vector<1x128xf32>
    %69 = arith.truncf %68 : vector<1x128xf32> to vector<1x128xbf16>
    %c0_29 = arith.constant 0 : index
    %c0_30 = arith.constant 0 : index
    %70 = vector.load %arg6[%c0_29, %c0_30] : memref<128x128xbf16, #tpu.memory_space<vmem>>, vector<128x128xbf16>
    %cst_31 = arith.constant dense<0.000000e+00> : vector<1x128xf32>
    %71 = tpu.matmul %69, %70, %cst_31 {dimension_numbers = #tpu.dot_dimension_numbers<[1], [0], [0], [1], [0, 0, 1, 1], [], []>} : vector<1x128xbf16>, vector<128x128xbf16>, vector<1x128xf32> -> vector<1x128xf32>
    %c0_32 = arith.constant 0 : index
    %c0_33 = arith.constant 0 : index
    %72 = vector.load %arg7[%c0_32, %c0_33] : memref<1x128xf32, #tpu.memory_space<vmem>>, vector<1x128xf32>
    %73 = arith.addf %71, %72 : vector<1x128xf32>
    %c0_34 = arith.constant 0 : index
    %c0_35 = arith.constant 0 : index
    %c0_36 = arith.constant 0 : index
    %74 = vector.load %arg8[%c0_34, %c0_35, %c0_36] : memref<1x1x128xf32, #tpu.memory_space<vmem>>, vector<1x1x128xf32>
    %75 = vector.shape_cast %74 : vector<1x1x128xf32> to vector<1x128xf32>
    %76 = vector.shape_cast %73 : vector<1x128xf32> to vector<1x1x128xf32>
    tpu.vector_store %arg8[%c0_34, %c0_35, %c0_36], %76 {strides = array<i32>} : memref<1x1x128xf32, #tpu.memory_space<vmem>>, vector<1x1x128xf32>,
    return
  }
  func.func @transform_0(%arg0: i32) -> (i32, i32, i32) {
    %c0_i32 = arith.constant 0 : i32
    %c0_i32_0 = arith.constant 0 : i32
    %c0_i32_1 = arith.constant 0 : i32
    return %arg0, %c0_i32, %c0_i32_0 : i32, i32, i32
  }
  func.func @transform_1(%arg0: i32) -> (i32, i32, i32) {
    %c0_i32 = arith.constant 0 : i32
    %c0_i32_0 = arith.constant 0 : i32
    %c0_i32_1 = arith.constant 0 : i32
    %c0_i32_2 = arith.constant 0 : i32
    return %c0_i32, %c0_i32_0, %c0_i32_1 : i32, i32, i32
  }
  func.func @transform_2(%arg0: i32) -> (i32, i32) {
    %c0_i32 = arith.constant 0 : i32
    %c0_i32_0 = arith.constant 0 : i32
    %c0_i32_1 = arith.constant 0 : i32
    return %c0_i32, %c0_i32_0 : i32, i32
  }
  func.func @transform_3(%arg0: i32) -> (i32, i32) {
    %c0_i32 = arith.constant 0 : i32
    %c0_i32_0 = arith.constant 0 : i32
    %c0_i32_1 = arith.constant 0 : i32
    return %c0_i32, %c0_i32_0 : i32, i32
  }
  func.func @transform_4(%arg0: i32) -> (i32, i32) {
    %c0_i32 = arith.constant 0 : i32
    %c0_i32_0 = arith.constant 0 : i32
    %c0_i32_1 = arith.constant 0 : i32
    return %c0_i32, %c0_i32_0 : i32, i32
  }
  func.func @transform_5(%arg0: i32) -> (i32, i32) {
    %c0_i32 = arith.constant 0 : i32
    %c0_i32_0 = arith.constant 0 : i32
    %c0_i32_1 = arith.constant 0 : i32
    return %c0_i32, %c0_i32_0 : i32, i32
  }
  func.func @transform_6(%arg0: i32) -> (i32, i32) {
    %c0_i32 = arith.constant 0 : i32
    %c0_i32_0 = arith.constant 0 : i32
    %c0_i32_1 = arith.constant 0 : i32
    return %c0_i32, %c0_i32_0 : i32, i32
  }
  func.func @transform_7(%arg0: i32) -> (i32, i32, i32) {
    %c0_i32 = arith.constant 0 : i32
    %c0_i32_0 = arith.constant 0 : i32
    %c0_i32_1 = arith.constant 0 : i32
    return %arg0, %c0_i32, %c0_i32_0 : i32, i32, i32
  }
}

</mosaic_0001>

<bundles_post_ra>
// kernel: seq2seq_forward.1
= control target key start
LH: loop header
LB: loop body
LE: loop exit
PB: predicated region body
PF: predicated region fallthrough
CT: control target
= control target key end

     0   :  { %12 = vsyncpa [#allocation3], 0  ;;  %s6058_s0 = inlined_call_operand.vmem [shape: f32[2,18,72], index: 0, kind: input, shape index: {}]   ;;  %s6059_s1 = inlined_call_operand.vmem [shape: bf16[3,72,2048], index: 1, kind: input, shape index: {}]   ;;  %s6060_s2 = inlined_call_operand.vmem [shape: f32[1,2048], index: 2, kind: input, shape index: {}]   ;;  %s6061_s3 = inlined_call_operand.vmem [shape: bf16[128,128], index: 3, kind: input, shape index: {}]   ;;  %s6062_s4 = inlined_call_operand.vmem [shape: f32[1,128], index: 4, kind: input, shape index: {}]   ;;  %s6063_s5 = inlined_call_operand.vmem [shape: bf16[128,128], index: 5, kind: input, shape index: {}]   ;;  %s6064_s6 = inlined_call_operand.vmem [shape: f32[1,128], index: 6, kind: input, shape index: {}]   ;;  %s6065_s7 = inlined_call_operand.hbm [shape: f32[2,1,128], index: 7, kind: output, shape index: {}]  }
   0x1   :  { %14 = vsyncpa [#allocation3 + $0x1], 0  ;;  %s4298_s24 = smov 0   ;;  %s4300_s25 = smov 0  }
   0x2   :  { %s4302_s26 = smov 0   ;;  %s4304_s27 = smov 0  }
   0x3 LB: > { %s4319_s28 = sadd.s32 4294967295, %s4256_s27   ;;  %s2915_s29 = sadd.s32 4294967294, %s4256_s27   ;;  %s4256_s27 = sphi %s4304_s27, %s6071_s27   ;;  %s4252_s26 = sphi %s4302_s26, %s6070_s26   ;;  %s4248_s25 = sphi %s4300_s25, %s6069_s25   ;;  %s4244_s24 = sphi %s4298_s24, %s6068_s24  }
   0x4   : > { %s4323_s30 = sadd.s32 1, %s4256_s27   ;;  %s179_s8 = sadd.s32 1, %s4252_s26 }
   0x5   : > { %s176_s9 = ssub.s32 %s4256_s27, %s4323_s30  ;;  %p189_p0 = scmp.ne.s32.totalorder %s4252_s26, %s4248_s25 }
   0x6   : > { %p177_p1 = scmp.eq.s32.totalorder %s176_s9, 0  ;;  %p190_p2 = scmp.eq.s32.totalorder %s4319_s28, 1 }
   0x7   : > { %p195_p3 = scmp.ne.s32.totalorder %s4248_s25, %s4244_s24  ;;  %p196_p4 = scmp.eq.s32.totalorder %s2915_s29, 1 }
   0x8   : > { %s4334_s10 = scalar_select %p177_p1, %s4252_s26, %s179_s8  }
   0x9   : > { %p4336_p5 = por %p190_p2, %p189_p0  ;;  %p4340_p6 = por %p196_p4, %p195_p3 }
   0xa   : > { %p2918_p7 = scmp.ge.s32.totalorder %s4256_s27, 1  ;;  %p240_p8 = scmp.lt.s32.totalorder %s4256_s27, 3 }
   0xc   : > { %p241_p9 = pnand %p2918_p7, %p240_p8 }
   0xd   : > { %p271_p10 = scmp.lt.s32.totalorder (!%p241_p9), %s4319_s28, 1  ;;  %s269_s9 = sand.u32 (!%p241_p9), 1, %s4248_s25  }
   0xe   : > { %244 = sbr.rel (%p241_p9) target bundleno = 718 (0x2ce), region = 48  ;;  %s2856_s16 = scalar_lea.hbm (!%p241_p9), %s6065_s7, %s4319_s28 }
   0xf   : > { %s270_s19 = scalar_lea.vmem (!%p241_p9), [#allocation2], %s269_s9  ;;  %s2860_s21 = sshll.u32 (!%p241_p9), %s2856_s16, 4  ;;  %s2861_s21 = int_to_ptr.hbm [resolvable:$true] %s2860_s21 }
  0x10   : > { %s2848_s22 = scalar_lea.sflag (!%p241_p9), [#allocation3], %s269_s9  ;;  %s4208_s23 = sshra.s32 (!%p241_p9), %s2861_s21, 4  ;;  %s4209_s23 = int_to_ptr.hbm [resolvable:$true] %s4208_s23 }
  0x11   : > { %s4214_s8 = scalar_lea.hbm (!%p241_p9), %s6065_s7, 2  ;;  %p4215_p0 = scmp.lt.s32.totalorder (!%p241_p9), %s4209_s23, %s6065_s7 }
  0x13   : > { %v2984_v0 = vld [vmem:[%s6059_s1 + $0x440] sm:$0xff]  ;;  %v2986_v1 = vld [vmem:[%s6059_s1 + $0x450] sm:$0xff]  ;;  %vm794_vm0 = vcmask 1043456   ;;  %v2985_v46 = vld [vmem:[%s6059_s1 + $0x448] sm:$0xff]  ;;  %s272_s13 = scalar_select %p271_p10, %s4319_s28, 1  ;;  %vm790_vm1 = vcmask 588800  }
  0x14   : > { %v630_v2 = vunpack.c.l.b16 %v2984_v0  ;;  %v631_v3 = vunpack.c.h.b16 %v2984_v0  ;;  %v634_v4 = vunpack.c.l.b16 %v2986_v1  ;;  %v635_v5 = vunpack.c.h.b16 %v2986_v1  ;;  %v3186_v6 = vld [vmem:[%s6059_s1 + $0x3c0] sm:$0xf]  ;;  %v4058_v12 = vld [vmem:[%s6059_s1 + $0x3c4] sm:$0xf]  ;;  %v3202_v14 = vld [vmem:[%s6059_s1 + $0x3d0] sm:$0xf] }
  0x15   : > { %v4066_v7 = vld [vmem:[%s6059_s1 + $0x3fc] sm:$0xf0]  ;;  %v3188_v13 = vld [vmem:[%s6059_s1 + $0x400] sm:$0xf0]  ;;  %v4068_v15 = vld [vmem:[%s6059_s1 + $0x40c] sm:$0xf0]  ;;  %v632_v48 = vunpack.c.l.b16 %v2985_v46  ;;  %v633_v49 = vunpack.c.h.b16 %v2985_v46 }
  0x16   : > { %v710_v8 = vpack.c.b16 %v630_v2, %v630_v2  ;;  %v711_v9 = vpack.c.b16 %v631_v3, %v631_v3  ;;  %v714_v10 = vpack.c.b16 %v634_v4, %v634_v4  ;;  %v715_v11 = vpack.c.b16 %v635_v5, %v635_v5  ;;  %v4060_v16 = vld [vmem:[%s6059_s1 + $0x3d4] sm:$0xf]  ;;  %v3122_v24 = vld [vmem:[%s6059_s1 + $0x340] sm:$0xf]  ;;  %v4042_v28 = vld [vmem:[%s6059_s1 + $0x344] sm:$0xf] }
  0x17   : > { %v3204_v17 = vld [vmem:[%s6059_s1 + $0x410] sm:$0xf0]  ;;  %v3187_v22 = vor.u32 %v4066_v7, %v3186_v6  ;;  %v3191_v23 = vor.u32 %v4058_v12, %v3188_v13  ;;  %v4050_v25 = vld [vmem:[%s6059_s1 + $0x37c] sm:$0xf0]  ;;  %v3203_v26 = vor.u32 %v4068_v15, %v3202_v14  ;;  %v3124_v29 = vld [vmem:[%s6059_s1 + $0x380] sm:$0xf0]  ;;  %v712_v1 = vpack.c.b16 %v632_v48, %v632_v48 }
  0x18   : > { %v796_v18 = vsel %vm794_vm0, %v710_v8, 0  ;;  %v799_v19 = vsel %vm794_vm0, %v711_v9, 0  ;;  %v808_v20 = vsel %vm794_vm0, %v714_v10, 0  ;;  %v811_v21 = vsel %vm794_vm0, %v715_v11, 0  ;;  %v3138_v30 = vld [vmem:[%s6059_s1 + $0x350] sm:$0xf] }
  0x19   : > { %846 = vmatpush.bf16.msra.mxu2 %v796_v18  ;;  %860 = vmatpush.bf16.msra.mxu3 %v799_v19  ;;  %v3207_v27 = vor.u32 %v4060_v16, %v3204_v17  ;;  %v4052_v31 = vld [vmem:[%s6059_s1 + $0x38c] sm:$0xf0]  ;;  %v4044_v32 = vld [vmem:[%s6059_s1 + $0x354] sm:$0xf]  ;;  %v3058_v34 = vld [vmem:[%s6059_s1 + $0x2c0] sm:$0xf]  ;;  %v3123_v35 = vor.u32 %v4050_v25, %v3122_v24  ;;  %v3127_v36 = vor.u32 %v4042_v28, %v3124_v29 }
  0x1a   : > { %902 = vmatpush.bf16.msra.mxu0 %v808_v20  ;;  %916 = vmatpush.bf16.msra.mxu1 %v811_v21  ;;  %v3140_v33 = vld [vmem:[%s6059_s1 + $0x390] sm:$0xf0]  ;;  %v4034_v37 = vld [vmem:[%s6059_s1 + $0x2fc] sm:$0xf0]  ;;  %v4026_v38 = vld [vmem:[%s6059_s1 + $0x2c4] sm:$0xf]  ;;  %v3139_v40 = vor.u32 %v4052_v31, %v3138_v30  ;;  %v713_v2 = vpack.c.b16 %v633_v49, %v633_v49 }
  0x1b   : > { %v3060_v39 = vld [vmem:[%s6059_s1 + $0x300] sm:$0xf0]  ;;  %v3143_v41 = vor.u32 %v4044_v32, %v3140_v33  ;;  %v3074_v42 = vld [vmem:[%s6059_s1 + $0x2d0] sm:$0xf]  ;;  %v4028_v44 = vld [vmem:[%s6059_s1 + $0x2d4] sm:$0xf]  ;;  %v3059_v50 = vor.u32 %v4034_v37, %v3058_v34 }
  0x1c   : > { %v4036_v43 = vld [vmem:[%s6059_s1 + $0x30c] sm:$0xf0]  ;;  %v3076_v45 = vld [vmem:[%s6059_s1 + $0x310] sm:$0xf0]  ;;  %v2988_v47 = vld [vmem:[%s6059_s1 + $0x460] sm:$0xff]  ;;  %v3063_v51 = vor.u32 %v4026_v38, %v3060_v39  ;;  %s4154_s29 = smul.u32 24, %s272_s13 }
  0x1d   : > { %847 = vmatpush.bf16.msra.mxu2 %v3187_v22  ;;  %861 = vmatpush.bf16.msra.mxu3 %v3191_v23  ;;  %v2994_v52 = vld [vmem:[%s6059_s1 + $0x240] sm:$0xf]  ;;  %v4010_v54 = vld [vmem:[%s6059_s1 + $0x244] sm:$0xf]  ;;  %v638_v55 = vunpack.c.l.b16 %v2988_v47  ;;  %v639_v56 = vunpack.c.h.b16 %v2988_v47  ;;  %v3075_v57 = vor.u32 %v4036_v43, %v3074_v42  ;;  %v3079_v58 = vor.u32 %v4028_v44, %v3076_v45  ;;  %v3010_v60 = vld [vmem:[%s6059_s1 + $0x250] sm:$0xf] }
  0x1e   : > { %903 = vmatpush.bf16.msra.mxu0 %v3203_v26  ;;  %917 = vmatpush.bf16.msra.mxu1 %v3207_v27  ;;  %v4018_v53 = vld [vmem:[%s6059_s1 + $0x27c] sm:$0xf0]  ;;  %v2996_v59 = vld [vmem:[%s6059_s1 + $0x280] sm:$0xf0]  ;;  %v4020_v61 = vld [vmem:[%s6059_s1 + $0x28c] sm:$0xf0]  ;;  %s4465_s20 = scalar_lea.vmem %s6058_s0, %s4154_s29 }
  0x1f   : > { %v4012_v62 = vld [vmem:[%s6059_s1 + $0x254] sm:$0xf]  ;;  %v2995_v0 = vor.u32 %v4018_v53, %v2994_v52  ;;  %v2999_v3 = vor.u32 %v4010_v54, %v2996_v59  ;;  %v718_v4 = vpack.c.b16 %v638_v55, %v638_v55  ;;  %v719_v5 = vpack.c.b16 %v639_v56, %v639_v56  ;;  %v3194_v8 = vld [vmem:[%s6059_s1 + $0x3c8] sm:$0xf]  ;;  %v4059_v12 = vld [vmem:[%s6059_s1 + $0x3cc] sm:$0xf] }
  0x20   : > { %v3012_v63 = vld [vmem:[%s6059_s1 + $0x290] sm:$0xf0]  ;;  %v3011_v6 = vor.u32 %v4020_v61, %v3010_v60  ;;  %v354_v9 = vld [vmem:[%s4465_s20 + $0x1] sm:$0xff]  ;;  %v355_v10 = vld [vmem:[%s4465_s20 + $0x9] sm:$0xff]  ;;  %v802_v14 = vsel %vm794_vm0, %v712_v1, 0  ;;  %v805_v15 = vsel %vm794_vm0, %v713_v2, 0 }
  0x21   : > { %848 = vmatpush.bf16.msra.mxu2 %v3123_v35  ;;  %862 = vmatpush.bf16.msra.mxu3 %v3127_v36  ;;  %v3015_v7 = vor.u32 %v4012_v62, %v3012_v63  ;;  %v4067_v11 = vld [vmem:[%s6059_s1 + $0x404] sm:$0xf0]  ;;  %v3196_v13 = vld [vmem:[%s6059_s1 + $0x408] sm:$0xf0]  ;;  %v3218_v16 = vld [vmem:[%s6059_s1 + $0x3e0] sm:$0xf]  ;;  %v4497_v22 = vpack.c.bf16 %v355_v10, %v354_v9 }
  0x22   : > { %904 = vmatpush.bf16.msra.mxu0 %v3139_v40  ;;  %918 = vmatpush.bf16.msra.mxu1 %v3143_v41  ;;  %v4070_v17 = vld [vmem:[%s6059_s1 + $0x41c] sm:$0xf0]  ;;  %v820_v18 = vsel %vm794_vm0, %v718_v4, 0  ;;  %v823_v19 = vsel %vm794_vm0, %v719_v5, 0  ;;  %v4062_v20 = vld [vmem:[%s6059_s1 + $0x3e4] sm:$0xf]  ;;  %v3195_v23 = vor.u32 %v4067_v11, %v3194_v8  ;;  %v3199_v24 = vor.u32 %v4059_v12, %v3196_v13 }
  0x23   : > { %v3220_v21 = vld [vmem:[%s6059_s1 + $0x420] sm:$0xf0]  ;;  %v3130_v25 = vld [vmem:[%s6059_s1 + $0x348] sm:$0xf]  ;;  %v2987_v27 = vld [vmem:[%s6059_s1 + $0x458] sm:$0xff]  ;;  %v3219_v28 = vor.u32 %v4070_v17, %v3218_v16  ;;  %s2858_s13 = sshll.u32 %s270_s19, 4  ;;  %s2859_s13 = int_to_ptr.vmem [resolvable:$true] %s2858_s13 }
  0x24   : > { %v4051_v26 = vld [vmem:[%s6059_s1 + $0x384] sm:$0xf0]  ;;  %v3223_v29 = vor.u32 %v4062_v20, %v3220_v21  ;;  %v4043_v30 = vld [vmem:[%s6059_s1 + $0x34c] sm:$0xf]  ;;  %v3154_v32 = vld [vmem:[%s6059_s1 + $0x360] sm:$0xf]  ;;  %v636_v41 = vunpack.c.l.b16 %v2987_v27  ;;  %v637_v47 = vunpack.c.h.b16 %v2987_v27 }
  0x25   : > { %849 = vmatpush.bf16.msra.mxu2 %v3059_v50  ;;  %863 = vmatpush.bf16.msra.mxu3 %v3063_v51  ;;  %v3132_v31 = vld [vmem:[%s6059_s1 + $0x388] sm:$0xf0]  ;;  %v4054_v33 = vld [vmem:[%s6059_s1 + $0x39c] sm:$0xf0]  ;;  %v4046_v34 = vld [vmem:[%s6059_s1 + $0x364] sm:$0xf]  ;;  %v3131_v37 = vor.u32 %v4051_v26, %v3130_v25 }
  0x26   : > { %905 = vmatpush.bf16.msra.mxu0 %v3075_v57  ;;  %919 = vmatpush.bf16.msra.mxu1 %v3079_v58  ;;  %v3156_v35 = vld [vmem:[%s6059_s1 + $0x3a0] sm:$0xf0]  ;;  %v2990_v36 = vld [vmem:[%s6059_s1 + $0x470] sm:$0xff]  ;;  %v3135_v38 = vor.u32 %v4043_v30, %v3132_v31  ;;  %v3066_v39 = vld [vmem:[%s6059_s1 + $0x2c8] sm:$0xf]  ;;  %v3155_v42 = vor.u32 %v4054_v33, %v3154_v32  ;;  %v716_v57 = vpack.c.b16 %v636_v41, %v636_v41  ;;  %s4210_s29 = scalar_lea.hbm %s4209_s23, 1 }
  0x27   : > { %v4035_v40 = vld [vmem:[%s6059_s1 + $0x304] sm:$0xf0]  ;;  %v3159_v43 = vor.u32 %v4046_v34, %v3156_v35  ;;  %v4027_v44 = vld [vmem:[%s6059_s1 + $0x2cc] sm:$0xf]  ;;  %v3090_v46 = vld [vmem:[%s6059_s1 + $0x2e0] sm:$0xf]  ;;  %v642_v51 = vunpack.c.l.b16 %v2990_v36  ;;  %v643_v52 = vunpack.c.h.b16 %v2990_v36  ;;  %v717_v63 = vpack.c.b16 %v637_v47, %v637_v47  ;;  %p4211_p11 = scmp.ne.s32.totalorder %s4209_s23, %s4210_s29  ;;  %p4216_p1 = scmp.lt.s32.totalorder %s4214_s8, %s4210_s29 }
  0x28   : > { %v3068_v45 = vld [vmem:[%s6059_s1 + $0x308] sm:$0xf0]  ;;  %v4038_v48 = vld [vmem:[%s6059_s1 + $0x31c] sm:$0xf0]  ;;  %v4030_v49 = vld [vmem:[%s6059_s1 + $0x2e4] sm:$0xf]  ;;  %v3067_v53 = vor.u32 %v4035_v40, %v3066_v39 }
  0x29   : > { %850 = vmatpush.bf16.msra.mxu2 %v2995_v0  ;;  %864 = vmatpush.bf16.msra.mxu3 %v2999_v3  ;;  %v3092_v50 = vld [vmem:[%s6059_s1 + $0x320] sm:$0xf0]  ;;  %v3071_v54 = vor.u32 %v4027_v44, %v3068_v45  ;;  %v3002_v55 = vld [vmem:[%s6059_s1 + $0x248] sm:$0xf]  ;;  %v3091_v58 = vor.u32 %v4038_v48, %v3090_v46  ;;  %v4011_v60 = vld [vmem:[%s6059_s1 + $0x24c] sm:$0xf]  ;;  %v722_v3 = vpack.c.b16 %v642_v51, %v642_v51  ;;  %p4212_p12 = pnand %p4211_p11, %p4336_p5  ;;  %p4217_p2 = por %p4216_p1, %p4215_p0 }
  0x2a   : > { %906 = vmatpush.bf16.msra.mxu0 %v3011_v6  ;;  %920 = vmatpush.bf16.msra.mxu1 %v3015_v7  ;;  %v4019_v56 = vld [vmem:[%s6059_s1 + $0x284] sm:$0xf0]  ;;  %v3095_v59 = vor.u32 %v4030_v49, %v3092_v50  ;;  %v3004_v61 = vld [vmem:[%s6059_s1 + $0x288] sm:$0xf0]  ;;  %v3026_v62 = vld [vmem:[%s6059_s1 + $0x260] sm:$0xf]  ;;  %v723_v4 = vpack.c.b16 %v643_v52, %v643_v52 }
  0x2b   : > { %v4022_v0 = vld [vmem:[%s6059_s1 + $0x29c] sm:$0xf0]  ;;  %v4014_v1 = vld [vmem:[%s6059_s1 + $0x264] sm:$0xf]  ;;  %v3003_v5 = vor.u32 %v4019_v56, %v3002_v55  ;;  %v3007_v6 = vor.u32 %v4011_v60, %v3004_v61  ;;  %v814_v9 = vsel %vm794_vm0, %v716_v57, 0  ;;  %v817_v10 = vsel %vm794_vm0, %v717_v63, 0  ;;  %p4213_p13 = pneg %p4212_p12 }
  0x2c   : > { %3248 = vmatmul.msk.bf16.vlgmr.msra.gmra.mxu2 %vm790_vm1, %v4497_v22  ;;  %3249 = vmatmul.msk.bf16.vlgmr.msra.gmra.mxu3 %vm790_vm1, %v4497_v22  ;;  %v3028_v2 = vld [vmem:[%s6059_s1 + $0x2a0] sm:$0xf0]  ;;  %v3027_v7 = vor.u32 %v4022_v0, %v3026_v62  ;;  %v832_v11 = vsel %vm794_vm0, %v722_v3, 0  ;;  %v835_v12 = vsel %vm794_vm0, %v723_v4, 0  ;;  %v3210_v13 = vld [vmem:[%s6059_s1 + $0x3d8] sm:$0xf] }
  0x2d   : > { %874 = vmatpush.bf16.msrb.mxu2 %v802_v14  ;;  %888 = vmatpush.bf16.msrb.mxu3 %v805_v15  ;;  %v3031_v8 = vor.u32 %v4014_v1, %v3028_v2  ;;  %v4069_v14 = vld [vmem:[%s6059_s1 + $0x414] sm:$0xf0]  ;;  %v4061_v15 = vld [vmem:[%s6059_s1 + $0x3dc] sm:$0xf]  ;;  %v3234_v17 = vld [vmem:[%s6059_s1 + $0x3f0] sm:$0xf]  ;;  %p4218_p3 = pnand %p4217_p2, %p4213_p13 }
  0x2e   : > { %958 = vmatpush.bf16.msrb.mxu0 %v820_v18  ;;  %972 = vmatpush.bf16.msrb.mxu1 %v823_v19  ;;  %v3212_v16 = vld [vmem:[%s6059_s1 + $0x418] sm:$0xf0]  ;;  %v4072_v18 = vld [vmem:[%s6059_s1 + $0x42c] sm:$0xf0]  ;;  %v4064_v19 = vld [vmem:[%s6059_s1 + $0x3f4] sm:$0xf]  ;;  %v3211_v21 = vor.u32 %v4069_v14, %v3210_v13 }
  0x2f   : > { %3252 = vmatmul.msk.bf16.vlgmr.msra.gmra.mxu0 %vm790_vm1, %v4497_v22  ;;  %3253 = vmatmul.msk.bf16.vlgmr.msra.gmra.mxu1 %vm790_vm1, %v4497_v22  ;;  %v3236_v20 = vld [vmem:[%s6059_s1 + $0x430] sm:$0xf0]  ;;  %v4053_v25 = vld [vmem:[%s6059_s1 + $0x394] sm:$0xf0]  ;;  %v3235_v26 = vor.u32 %v4072_v18, %v3234_v17  ;;  %v3170_v30 = vld [vmem:[%s6059_s1 + $0x370] sm:$0xf] }
  0x30   : > { %v3239_v27 = vor.u32 %v4064_v19, %v3236_v20  ;;  %v4056_v31 = vld [vmem:[%s6059_s1 + $0x3ac] sm:$0xf0]  ;;  %v4048_v32 = vld [vmem:[%s6059_s1 + $0x374] sm:$0xf]  ;;  %v3082_v34 = vld [vmem:[%s6059_s1 + $0x2d8] sm:$0xf] }
  0x31   : > { %875 = vmatpush.bf16.msrb.mxu2 %v3195_v23  ;;  %889 = vmatpush.bf16.msrb.mxu3 %v3199_v24  ;;  %v3215_v23 = vor.u32 %v4061_v15, %v3212_v16  ;;  %v3146_v24 = vld [vmem:[%s6059_s1 + $0x358] sm:$0xf]  ;;  %v3172_v33 = vld [vmem:[%s6059_s1 + $0x3b0] sm:$0xf0]  ;;  %v2989_v39 = vld [vmem:[%s6059_s1 + $0x468] sm:$0xff]  ;;  %v3171_v40 = vor.u32 %v4056_v31, %v3170_v30 }
  0x32   : > { %959 = vmatpush.bf16.msrb.mxu0 %v3219_v28  ;;  %973 = vmatpush.bf16.msrb.mxu1 %v3223_v29  ;;  %v4045_v28 = vld [vmem:[%s6059_s1 + $0x35c] sm:$0xf]  ;;  %v3147_v35 = vor.u32 %v4053_v25, %v3146_v24  ;;  %v3175_v41 = vor.u32 %v4048_v32, %v3172_v33  ;;  %v346_v44 = vld [vmem:[%s6059_s1 + $0x200] sm:$0xff]  ;;  %v4040_v45 = vld [vmem:[%s6059_s1 + $0x32c] sm:$0xf0]  ;;  %v640_v48 = vunpack.c.l.b16 %v2989_v39  ;;  %v641_v49 = vunpack.c.h.b16 %v2989_v39 }
  0x33   : > { %v3148_v29 = vld [vmem:[%s6059_s1 + $0x398] sm:$0xf0]  ;;  %v4032_v46 = vld [vmem:[%s6059_s1 + $0x2f4] sm:$0xf]  ;;  %v3018_v52 = vld [vmem:[%s6059_s1 + $0x258] sm:$0xf]  ;;  %v1268_v55 = vunpack.c.h.b16 %v346_v44 }
  0x34   : > { %v3151_v36 = vor.u32 %v4045_v28, %v3148_v29  ;;  %v3108_v47 = vld [vmem:[%s6059_s1 + $0x330] sm:$0xf0]  ;;  %v3042_v60 = vld [vmem:[%s6059_s1 + $0x270] sm:$0xf]  ;;  %v720_v1 = vpack.c.b16 %v640_v48, %v640_v48  ;;  %v721_v2 = vpack.c.b16 %v641_v49, %v641_v49  ;;  %v3458_v14 = vld [vmem:[%s6059_s1 + $0x180] sm:$0xf] }
  0x35   : > { %876 = vmatpush.bf16.msrb.mxu2 %v3131_v37  ;;  %890 = vmatpush.bf16.msrb.mxu3 %v3135_v38  ;;  %v4037_v37 = vld [vmem:[%s6059_s1 + $0x314] sm:$0xf0]  ;;  %v4029_v38 = vld [vmem:[%s6059_s1 + $0x2dc] sm:$0xf]  ;;  %v3111_v57 = vor.u32 %v4032_v46, %v3108_v47  ;;  %v4024_v61 = vld [vmem:[%s6059_s1 + $0x2ac] sm:$0xf0] }
  0x36   : > { %960 = vmatpush.bf16.msrb.mxu0 %v3155_v42  ;;  %974 = vmatpush.bf16.msrb.mxu1 %v3159_v43  ;;  %v3084_v42 = vld [vmem:[%s6059_s1 + $0x318] sm:$0xf0]  ;;  %v3106_v43 = vld [vmem:[%s6059_s1 + $0x2f0] sm:$0xf]  ;;  %v3083_v50 = vor.u32 %v4037_v37, %v3082_v34  ;;  %v4016_v62 = vld [vmem:[%s6059_s1 + $0x274] sm:$0xf] }
  0x37   : > { %v3087_v51 = vor.u32 %v4029_v38, %v3084_v42  ;;  %v3107_v56 = vor.u32 %v4040_v45, %v3106_v43  ;;  %v3044_v63 = vld [vmem:[%s6059_s1 + $0x2b0] sm:$0xf0]  ;;  %v829_v13 = vsel %vm794_vm0, %v721_v2, 0  ;;  %v4002_v15 = vld [vmem:[%s6059_s1 + $0x1bc] sm:$0xf0]  ;;  %v2991_v30 = vld [vmem:[%s6059_s1 + $0x478] sm:$0xff] }
  0x38   : > { %v3994_v18 = vld [vmem:[%s6059_s1 + $0x184] sm:$0xf]  ;;  %v4055_v24 = vld [vmem:[%s6059_s1 + $0x3a4] sm:$0xf0]  ;;  %v4047_v25 = vld [vmem:[%s6059_s1 + $0x36c] sm:$0xf]  ;;  %v644_v39 = vunpack.c.l.b16 %v2991_v30  ;;  %v645_v45 = vunpack.c.h.b16 %v2991_v30 }
  0x39   : > { %877 = vmatpush.bf16.msrb.mxu2 %v3067_v53  ;;  %891 = vmatpush.bf16.msrb.mxu3 %v3071_v54  ;;  %v4021_v53 = vld [vmem:[%s6059_s1 + $0x294] sm:$0xf0]  ;;  %v1267_v54 = vunpack.c.l.b16 %v346_v44  ;;  %v3460_v19 = vld [vmem:[%s6059_s1 + $0x1c0] sm:$0xf0]  ;;  %v3164_v28 = vld [vmem:[%s6059_s1 + $0x3a8] sm:$0xf0] }
  0x3a   : > { %961 = vmatpush.bf16.msrb.mxu0 %v3091_v58  ;;  %975 = vmatpush.bf16.msrb.mxu1 %v3095_v59  ;;  %v4013_v58 = vld [vmem:[%s6059_s1 + $0x25c] sm:$0xf]  ;;  %v3019_v0 = vor.u32 %v4021_v53, %v3018_v52  ;;  %v3394_v29 = vld [vmem:[%s6059_s1 + $0x100] sm:$0xf]  ;;  %v3978_v32 = vld [vmem:[%s6059_s1 + $0x104] sm:$0xf] }
  0x3b   : > { %v3020_v59 = vld [vmem:[%s6059_s1 + $0x298] sm:$0xf0]  ;;  %v1347_v4 = vpack.c.b16 %v1267_v54, %v1267_v54  ;;  %v3986_v31 = vld [vmem:[%s6059_s1 + $0x13c] sm:$0xf0]  ;;  %v3396_v33 = vld [vmem:[%s6059_s1 + $0x140] sm:$0xf0] }
  0x3c   : > { %v3023_v3 = vor.u32 %v4013_v58, %v3020_v59  ;;  %v348_v34 = vld [vmem:[%s6059_s1 + $0x210] sm:$0xff]  ;;  %v3098_v37 = vld [vmem:[%s6059_s1 + $0x2e8] sm:$0xf]  ;;  %v4031_v42 = vld [vmem:[%s6059_s1 + $0x2ec] sm:$0xf] }
  0x3d   : > { %878 = vmatpush.bf16.msrb.mxu2 %v3003_v5  ;;  %892 = vmatpush.bf16.msrb.mxu3 %v3007_v6  ;;  %v1348_v5 = vpack.c.b16 %v1268_v55, %v1268_v55  ;;  %v3043_v6 = vor.u32 %v4024_v61, %v3042_v60  ;;  %v1431_v16 = vsel %vm794_vm0, %v1347_v4, 0  ;;  %v4039_v38 = vld [vmem:[%s6059_s1 + $0x324] sm:$0xf0]  ;;  %v3100_v43 = vld [vmem:[%s6059_s1 + $0x328] sm:$0xf0]  ;;  %v1271_v49 = vunpack.c.l.b16 %v348_v34 }
  0x3e   : > { %962 = vmatpush.bf16.msrb.mxu0 %v3027_v7  ;;  %976 = vmatpush.bf16.msrb.mxu1 %v3031_v8  ;;  %v3047_v7 = vor.u32 %v4016_v62, %v3044_v63  ;;  %v3226_v8 = vld [vmem:[%s6059_s1 + $0x3e8] sm:$0xf]  ;;  %v3330_v44 = vld [vmem:[%s6059_s1 + $0x80] sm:$0xf]  ;;  %v3962_v47 = vld [vmem:[%s6059_s1 + $0x84] sm:$0xf]  ;;  %v3103_v52 = vor.u32 %v4031_v42, %v3100_v43  ;;  %v724_v55 = vpack.c.b16 %v644_v39, %v644_v39 }
  0x3f   : > { %v1434_v17 = vsel %vm794_vm0, %v1348_v5, 0  ;;  %v3970_v46 = vld [vmem:[%s6059_s1 + $0xbc] sm:$0xf0]  ;;  %v3332_v48 = vld [vmem:[%s6059_s1 + $0xc0] sm:$0xf0]  ;;  %v725_v61 = vpack.c.b16 %v645_v45, %v645_v45 }
  0x40   : > { %3250 = vmatmul.msk.bf16.vlgmr.msrb.gmra.mxu2 %vm790_vm1, %v4497_v22  ;;  %3251 = vmatmul.msk.bf16.vlgmr.msrb.gmra.mxu3 %vm790_vm1, %v4497_v22  ;;  %v3034_v53 = vld [vmem:[%s6059_s1 + $0x268] sm:$0xf]  ;;  %v4015_v58 = vld [vmem:[%s6059_s1 + $0x26c] sm:$0xf]  ;;  %v3266_v60 = vld [vmem:[%s6059_s1] sm:$0xf] }
  0x41   : > { %930 = vmatpush.bf16.msra.mxu2 %v814_v9  ;;  %944 = vmatpush.bf16.msra.mxu3 %v817_v10  ;;  %v4071_v9 = vld [vmem:[%s6059_s1 + $0x424] sm:$0xf0]  ;;  %v4063_v10 = vld [vmem:[%s6059_s1 + $0x3ec] sm:$0xf]  ;;  %v3954_v62 = vld [vmem:[%s6059_s1 + $0x3c] sm:$0xf0] }
  0x42   : > { %1014 = vmatpush.bf16.msra.mxu0 %v832_v11  ;;  %1028 = vmatpush.bf16.msra.mxu1 %v835_v12  ;;  %v3228_v11 = vld [vmem:[%s6059_s1 + $0x428] sm:$0xf0]  ;;  %v826_v12 = vsel %vm794_vm0, %v720_v1, 0  ;;  %v3227_v20 = vor.u32 %v4071_v9, %v3226_v8  ;;  %v4023_v54 = vld [vmem:[%s6059_s1 + $0x2a4] sm:$0xf0]  ;;  %v1351_v1 = vpack.c.b16 %v1271_v49, %v1271_v49  ;;  %v3267_v5 = vor.u32 %v3954_v62, %v3266_v60  ;;  %v279_v9 = vld [vmem:[%s4465_s20] sm:$0xff] }
  0x43   : > { %3256 = vmatmul.msk.bf16.vlgmr.msrb.gmra.mxu0 %vm790_vm1, %v4497_v22  ;;  %3257 = vmatmul.msk.bf16.vlgmr.msrb.gmra.mxu1 %vm790_vm1, %v4497_v22  ;;  %v3036_v59 = vld [vmem:[%s6059_s1 + $0x2a8] sm:$0xf0]  ;;  %v3946_v63 = vld [vmem:[%s6059_s1 + $0x4] sm:$0xf]  ;;  %v841_v8 = vsel %vm794_vm0, %v725_v61, 0 }
  0x44   : > { %v3039_v4 = vor.u32 %v4015_v58, %v3036_v59  ;;  %v3180_v30 = vld [vmem:[%s6059_s1 + $0x3b8] sm:$0xf0]  ;;  %v3114_v39 = vld [vmem:[%s6059_s1 + $0x2f8] sm:$0xf]  ;;  %v3346_v45 = vld [vmem:[%s6059_s1 + $0x90] sm:$0xf] }
  0x45   : > { %931 = vmatpush.bf16.msra.mxu2 %v3211_v21  ;;  %945 = vmatpush.bf16.msra.mxu3 %v3215_v23  ;;  %v3231_v21 = vor.u32 %v4063_v10, %v3228_v11  ;;  %v3162_v23 = vld [vmem:[%s6059_s1 + $0x368] sm:$0xf]  ;;  %v1443_v11 = vsel %vm794_vm0, %v1351_v1, 0  ;;  %v3964_v49 = vld [vmem:[%s6059_s1 + $0x94] sm:$0xf] }
  0x46   : > { %1015 = vmatpush.bf16.msra.mxu0 %v3235_v26  ;;  %1029 = vmatpush.bf16.msra.mxu1 %v3239_v27  ;;  %v3459_v26 = vor.u32 %v4002_v15, %v3458_v14  ;;  %v3463_v27 = vor.u32 %v3994_v18, %v3460_v19  ;;  %v280_v10 = vld [vmem:[%s4465_s20 + $0x8] sm:$0xff]  ;;  %v4073_v14 = vld [vmem:[%s6059_s1 + $0x434] sm:$0xf0]  ;;  %v4065_v15 = vld [vmem:[%s6059_s1 + $0x3fc] sm:$0xf] }
  0x47   : > { %v4834_v18 = vpack.c.bf16 %v280_v10, %v279_v9  ;;  %v4004_v19 = vld [vmem:[%s6059_s1 + $0x1cc] sm:$0xf0]  ;;  %v4017_v59 = vld [vmem:[%s6059_s1 + $0x27c] sm:$0xf]  ;;  %v3948_v1 = vld [vmem:[%s6059_s1 + $0x14] sm:$0xf] }
  0x48   : > { %v3052_v60 = vld [vmem:[%s6059_s1 + $0x2b8] sm:$0xf0]  ;;  %v3282_v61 = vld [vmem:[%s6059_s1 + $0x10] sm:$0xf] }
  0x49   : > { %932 = vmatpush.bf16.msra.mxu2 %v3147_v35  ;;  %946 = vmatpush.bf16.msra.mxu3 %v3151_v36  ;;  %v3163_v35 = vor.u32 %v4055_v24, %v3162_v23  ;;  %v3167_v36 = vor.u32 %v4047_v25, %v3164_v28  ;;  %v3178_v25 = vld [vmem:[%s6059_s1 + $0x378] sm:$0xf] }
  0x4a   : > { %1016 = vmatpush.bf16.msra.mxu0 %v3171_v40  ;;  %1030 = vmatpush.bf16.msra.mxu1 %v3175_v41  ;;  %v3395_v40 = vor.u32 %v3986_v31, %v3394_v29  ;;  %v3399_v41 = vor.u32 %v3978_v32, %v3396_v33  ;;  %v3410_v31 = vld [vmem:[%s6059_s1 + $0x110] sm:$0xf]  ;;  %v3980_v33 = vld [vmem:[%s6059_s1 + $0x114] sm:$0xf] }
  0x4b   : > { %v3988_v32 = vld [vmem:[%s6059_s1 + $0x14c] sm:$0xf0] }
  0x4c   : > { %v3411_v42 = vor.u32 %v3988_v32, %v3410_v31  ;;  %v3426_v31 = vld [vmem:[%s6059_s1 + $0x120] sm:$0xf] }
  0x4d   : > { %933 = vmatpush.bf16.msra.mxu2 %v3083_v50  ;;  %947 = vmatpush.bf16.msra.mxu3 %v3087_v51  ;;  %v1272_v50 = vunpack.c.h.b16 %v348_v34  ;;  %v3099_v51 = vor.u32 %v4039_v38, %v3098_v37  ;;  %v3412_v34 = vld [vmem:[%s6059_s1 + $0x150] sm:$0xf0]  ;;  %v3990_v32 = vld [vmem:[%s6059_s1 + $0x15c] sm:$0xf0] }
  0x4e   : > { %1017 = vmatpush.bf16.msra.mxu0 %v3107_v56  ;;  %1031 = vmatpush.bf16.msra.mxu1 %v3111_v57  ;;  %v3331_v56 = vor.u32 %v3970_v46, %v3330_v44  ;;  %v3335_v57 = vor.u32 %v3962_v47, %v3332_v48  ;;  %v3415_v43 = vor.u32 %v3980_v33, %v3412_v34  ;;  %v3116_v44 = vld [vmem:[%s6059_s1 + $0x338] sm:$0xf0]  ;;  %v3972_v46 = vld [vmem:[%s6059_s1 + $0xcc] sm:$0xf0]  ;;  %v3982_v33 = vld [vmem:[%s6059_s1 + $0x124] sm:$0xf] }
  0x4f   : > { %v1352_v2 = vpack.c.b16 %v1272_v50, %v1272_v50  ;;  %v3348_v50 = vld [vmem:[%s6059_s1 + $0xd0] sm:$0xf0]  ;;  %v3428_v34 = vld [vmem:[%s6059_s1 + $0x160] sm:$0xf0] }
  0x50   : > { %v3351_v58 = vor.u32 %v3964_v49, %v3348_v50  ;;  %v3364_v49 = vld [vmem:[%s6059_s1 + $0xe0] sm:$0xf0] }
  0x51   : > { %934 = vmatpush.bf16.msra.mxu2 %v3019_v0  ;;  %948 = vmatpush.bf16.msra.mxu3 %v3023_v3  ;;  %v3268_v0 = vld [vmem:[%s6059_s1 + $0x40] sm:$0xf0]  ;;  %v3035_v3 = vor.u32 %v4023_v54, %v3034_v53 }
  0x52   : > { %1018 = vmatpush.bf16.msra.mxu0 %v3043_v6  ;;  %1032 = vmatpush.bf16.msra.mxu1 %v3047_v7  ;;  %v3271_v6 = vor.u32 %v3946_v63, %v3268_v0  ;;  %v838_v7 = vsel %vm794_vm0, %v724_v55, 0  ;;  %v3347_v55 = vor.u32 %v3972_v46, %v3346_v45  ;;  %v3956_v0 = vld [vmem:[%s6059_s1 + $0x4c] sm:$0xf0]  ;;  %v3974_v45 = vld [vmem:[%s6059_s1 + $0xdc] sm:$0xf0] }
  0x54   : > { %3254 = vmatmul.msk.bf16.vlgmr.msra.gmra.mxu2 %vm790_vm1, %v4497_v22  ;;  %3255 = vmatmul.msk.bf16.vlgmr.msra.gmra.mxu3 %vm790_vm1, %v4497_v22 }
  0x55   : > { %986 = vmatpush.bf16.msrb.mxu2 %v826_v12  ;;  %1000 = vmatpush.bf16.msrb.mxu3 %v829_v13  ;;  %v1446_v12 = vsel %vm794_vm0, %v1352_v2, 0  ;;  %v3242_v13 = vld [vmem:[%s6059_s1 + $0x3f8] sm:$0xf]  ;;  %v3284_v2 = vld [vmem:[%s6059_s1 + $0x50] sm:$0xf0] }
  0x56   : > { %1481 = vmatpush.bf16.msrb.mxu0 %v1431_v16  ;;  %1495 = vmatpush.bf16.msrb.mxu1 %v1434_v17  ;;  %v3244_v16 = vld [vmem:[%s6059_s1 + $0x438] sm:$0xf0]  ;;  %v3474_v17 = vld [vmem:[%s6059_s1 + $0x190] sm:$0xf]  ;;  %v3243_v23 = vor.u32 %v4073_v14, %v3242_v13  ;;  %v3466_v13 = vld [vmem:[%s6059_s1 + $0x188] sm:$0xf] }
  0x57   : > { %3260 = vmatmul.msk.bf16.vlgmr.msra.gmra.mxu0 %vm790_vm1, %v4497_v22  ;;  %3261 = vmatmul.msk.bf16.vlgmr.msra.gmra.mxu1 %vm790_vm1, %v4497_v22  ;;  %v3247_v24 = vor.u32 %v4065_v15, %v3244_v16  ;;  %v3475_v28 = vor.u32 %v4004_v19, %v3474_v17  ;;  %v4003_v14 = vld [vmem:[%s6059_s1 + $0x1c4] sm:$0xf0]  ;;  %v3995_v15 = vld [vmem:[%s6059_s1 + $0x18c] sm:$0xf]  ;;  %v3490_v17 = vld [vmem:[%s6059_s1 + $0x1a0] sm:$0xf] }
  0x58   : > { %v3468_v16 = vld [vmem:[%s6059_s1 + $0x1c8] sm:$0xf0]  ;;  %v4006_v19 = vld [vmem:[%s6059_s1 + $0x1dc] sm:$0xf0] }
  0x59   : > { %987 = vmatpush.bf16.msrb.mxu2 %v3227_v20  ;;  %1001 = vmatpush.bf16.msrb.mxu3 %v3231_v21  ;;  %v3996_v20 = vld [vmem:[%s6059_s1 + $0x194] sm:$0xf] }
  0x5a   : > { %1482 = vmatpush.bf16.msrb.mxu0 %v3459_v26  ;;  %1496 = vmatpush.bf16.msrb.mxu1 %v3463_v27  ;;  %v3476_v21 = vld [vmem:[%s6059_s1 + $0x1d0] sm:$0xf0]  ;;  %v4057_v26 = vld [vmem:[%s6059_s1 + $0x3b4] sm:$0xf0]  ;;  %v4049_v27 = vld [vmem:[%s6059_s1 + $0x37c] sm:$0xf] }
  0x5b   : > { %v3479_v29 = vor.u32 %v3996_v20, %v3476_v21  ;;  %v3179_v37 = vor.u32 %v4057_v26, %v3178_v25  ;;  %v3183_v38 = vor.u32 %v4049_v27, %v3180_v30  ;;  %v3998_v20 = vld [vmem:[%s6059_s1 + $0x1a4] sm:$0xf]  ;;  %v3402_v25 = vld [vmem:[%s6059_s1 + $0x108] sm:$0xf]  ;;  %v3979_v27 = vld [vmem:[%s6059_s1 + $0x10c] sm:$0xf] }
  0x5c   : > { %v3492_v21 = vld [vmem:[%s6059_s1 + $0x1e0] sm:$0xf0]  ;;  %v3987_v26 = vld [vmem:[%s6059_s1 + $0x144] sm:$0xf0]  ;;  %v3404_v30 = vld [vmem:[%s6059_s1 + $0x148] sm:$0xf0] }
  0x5d   : > { %988 = vmatpush.bf16.msrb.mxu2 %v3163_v35  ;;  %1002 = vmatpush.bf16.msrb.mxu3 %v3167_v36  ;;  %v347_v35 = vld [vmem:[%s6059_s1 + $0x208] sm:$0xff]  ;;  %v350_v36 = vld [vmem:[%s6059_s1 + $0x220] sm:$0xff] }
  0x5e   : > { %1483 = vmatpush.bf16.msrb.mxu0 %v3395_v40  ;;  %1497 = vmatpush.bf16.msrb.mxu1 %v3399_v41  ;;  %v4041_v40 = vld [vmem:[%s6059_s1 + $0x334] sm:$0xf0]  ;;  %v4033_v41 = vld [vmem:[%s6059_s1 + $0x2fc] sm:$0xf]  ;;  %v1269_v47 = vunpack.c.l.b16 %v347_v35  ;;  %v1270_v48 = vunpack.c.h.b16 %v347_v35 }
  0x5f   : > { %v3115_v53 = vor.u32 %v4041_v40, %v3114_v39  ;;  %v3119_v54 = vor.u32 %v4033_v41, %v3116_v44  ;;  %v349_v35 = vld [vmem:[%s6059_s1 + $0x218] sm:$0xff]  ;;  %v3338_v39 = vld [vmem:[%s6059_s1 + $0x88] sm:$0xf]  ;;  %v3427_v41 = vor.u32 %v3990_v32, %v3426_v31  ;;  %v3362_v44 = vld [vmem:[%s6059_s1 + $0xa0] sm:$0xf] }
  0x60   : > { %v1349_v62 = vpack.c.b16 %v1269_v47, %v1269_v47  ;;  %v1350_v63 = vpack.c.b16 %v1270_v48, %v1270_v48  ;;  %v3971_v40 = vld [vmem:[%s6059_s1 + $0xc4] sm:$0xf0]  ;;  %v1273_v46 = vunpack.c.l.b16 %v349_v35  ;;  %v1274_v47 = vunpack.c.h.b16 %v349_v35  ;;  %v3966_v48 = vld [vmem:[%s6059_s1 + $0xa4] sm:$0xf]  ;;  %v3992_v31 = vld [vmem:[%s6059_s1 + $0x16c] sm:$0xf0] }
  0x61   : > { %989 = vmatpush.bf16.msrb.mxu2 %v3099_v51  ;;  %1003 = vmatpush.bf16.msrb.mxu3 %v3103_v52  ;;  %v1275_v51 = vunpack.c.l.b16 %v350_v36  ;;  %v1276_v52 = vunpack.c.h.b16 %v350_v36  ;;  %v352_v36 = vld [vmem:[%s6059_s1 + $0x230] sm:$0xff]  ;;  %v3600_v35 = vld [vmem:[%s6059_s1 + $0x680] sm:$0xff] }
  0x62   : > { %1484 = vmatpush.bf16.msrb.mxu0 %v3331_v56  ;;  %1498 = vmatpush.bf16.msrb.mxu1 %v3335_v57  ;;  %v3050_v56 = vld [vmem:[%s6059_s1 + $0x278] sm:$0xf]  ;;  %v1437_v9 = vsel %vm794_vm0, %v1349_v62, 0  ;;  %v1440_v10 = vsel %vm794_vm0, %v1350_v63, 0  ;;  %v1279_v50 = vunpack.c.l.b16 %v352_v36  ;;  %v1354_v62 = vpack.c.b16 %v1274_v47, %v1274_v47  ;;  %v3958_v63 = vld [vmem:[%s6059_s1 + $0x5c] sm:$0xf0] }
  0x63   : > { %v4025_v57 = vld [vmem:[%s6059_s1 + $0x2b4] sm:$0xf0]  ;;  %v3984_v32 = vld [vmem:[%s6059_s1 + $0x134] sm:$0xf] }
  0x64   : > { %v3968_v47 = vld [vmem:[%s6059_s1 + $0xb4] sm:$0xf] }
  0x65   : > { %990 = vmatpush.bf16.msrb.mxu2 %v3035_v3  ;;  %1004 = vmatpush.bf16.msrb.mxu3 %v3039_v4  ;;  %v1355_v3 = vpack.c.b16 %v1275_v51, %v1275_v51  ;;  %v1356_v4 = vpack.c.b16 %v1276_v52, %v1276_v52  ;;  %v1280_v51 = vunpack.c.h.b16 %v352_v36  ;;  %v3339_v52 = vor.u32 %v3971_v40, %v3338_v39  ;;  %v3973_v39 = vld [vmem:[%s6059_s1 + $0xd4] sm:$0xf0]  ;;  %v3965_v40 = vld [vmem:[%s6059_s1 + $0x9c] sm:$0xf] }
  0x66   : > { %1485 = vmatpush.bf16.msrb.mxu0 %v3267_v5  ;;  %1499 = vmatpush.bf16.msrb.mxu1 %v3271_v6  ;;  %v3051_v5 = vor.u32 %v4025_v57, %v3050_v56  ;;  %v3055_v6 = vor.u32 %v4017_v59, %v3052_v60  ;;  %v3955_v56 = vld [vmem:[%s6059_s1 + $0x44] sm:$0xf0]  ;;  %v3367_v57 = vor.u32 %v3966_v48, %v3364_v49  ;;  %v3276_v59 = vld [vmem:[%s6059_s1 + $0x48] sm:$0xf0]  ;;  %v3298_v60 = vld [vmem:[%s6059_s1 + $0x20] sm:$0xf]  ;;  %v1978_v49 = vunpack.c.l.b16 %v3600_v35 }
  0x67   : > { %v3380_v48 = vld [vmem:[%s6059_s1 + $0xf0] sm:$0xf0] }
  0x68   : > { %3258 = vmatmul.msk.bf16.vlgmr.msrb.gmra.mxu2 %vm790_vm1, %v4497_v22  ;;  %3259 = vmatmul.msk.bf16.vlgmr.msrb.gmra.mxu3 %vm790_vm1, %v4497_v22 }
  0x69   : > { %1042 = vmatpush.bf16.msra.mxu2 %v838_v7  ;;  %1056 = vmatpush.bf16.msra.mxu3 %v841_v8  ;;  %v3283_v7 = vor.u32 %v3956_v0, %v3282_v61  ;;  %v3287_v8 = vor.u32 %v3948_v1, %v3284_v2  ;;  %v1353_v61 = vpack.c.b16 %v1273_v46, %v1273_v46  ;;  %v3950_v0 = vld [vmem:[%s6059_s1 + $0x24] sm:$0xf] }
  0x6a   : > { %1537 = vmatpush.bf16.msra.mxu0 %v1443_v11  ;;  %1551 = vmatpush.bf16.msra.mxu1 %v1446_v12  ;;  %v1455_v11 = vsel %vm794_vm0, %v1355_v3, 0  ;;  %v1458_v12 = vsel %vm794_vm0, %v1356_v4, 0  ;;  %v3300_v1 = vld [vmem:[%s6059_s1 + $0x60] sm:$0xf0]  ;;  %v1359_v2 = vpack.c.b16 %v1279_v50, %v1279_v50  ;;  %v1360_v3 = vpack.c.b16 %v1280_v51, %v1280_v51 }
  0x6b   : > { %3520 = vmatmul.msk.bf16.vlgmr.msrb.gmra.mxu0 %vm790_vm1, %v4834_v18  ;;  %3521 = vmatmul.msk.bf16.vlgmr.msrb.gmra.mxu1 %vm790_vm1, %v4834_v18  ;;  %v1979_v50 = vunpack.c.h.b16 %v3600_v35  ;;  %v3370_v35 = vld [vmem:[%s6059_s1 + $0xa8] sm:$0xf] }
  0x6d   : > { %1043 = vmatpush.bf16.msra.mxu2 %v3243_v23  ;;  %1057 = vmatpush.bf16.msra.mxu3 %v3247_v24  ;;  %v3467_v23 = vor.u32 %v4003_v14, %v3466_v13  ;;  %v3471_v24 = vor.u32 %v3995_v15, %v3468_v16  ;;  %v4005_v13 = vld [vmem:[%s6059_s1 + $0x1d4] sm:$0xf0]  ;;  %v3997_v14 = vld [vmem:[%s6059_s1 + $0x19c] sm:$0xf]  ;;  %v3506_v16 = vld [vmem:[%s6059_s1 + $0x1b0] sm:$0xf] }
  0x6e   : > { %1538 = vmatpush.bf16.msra.mxu0 %v3475_v28  ;;  %1552 = vmatpush.bf16.msra.mxu1 %v3479_v29  ;;  %v3491_v28 = vor.u32 %v4006_v19, %v3490_v17  ;;  %v3495_v29 = vor.u32 %v3998_v20, %v3492_v21  ;;  %v3484_v15 = vld [vmem:[%s6059_s1 + $0x1d8] sm:$0xf0]  ;;  %v4008_v17 = vld [vmem:[%s6059_s1 + $0x1ec] sm:$0xf0]  ;;  %v4000_v19 = vld [vmem:[%s6059_s1 + $0x1b4] sm:$0xf] }
  0x6f   : > { %v3508_v20 = vld [vmem:[%s6059_s1 + $0x1f0] sm:$0xf0] }
  0x71   : > { %1044 = vmatpush.bf16.msra.mxu2 %v3179_v37  ;;  %1058 = vmatpush.bf16.msra.mxu3 %v3183_v38  ;;  %v3403_v37 = vor.u32 %v3987_v26, %v3402_v25  ;;  %v3407_v38 = vor.u32 %v3979_v27, %v3404_v30  ;;  %v3989_v25 = vld [vmem:[%s6059_s1 + $0x154] sm:$0xf0]  ;;  %v3981_v26 = vld [vmem:[%s6059_s1 + $0x11c] sm:$0xf]  ;;  %v3507_v27 = vor.u32 %v4008_v17, %v3506_v16  ;;  %v3442_v30 = vld [vmem:[%s6059_s1 + $0x130] sm:$0xf] }
  0x72   : > { %1539 = vmatpush.bf16.msra.mxu0 %v3411_v42  ;;  %1553 = vmatpush.bf16.msra.mxu1 %v3415_v43  ;;  %v3431_v42 = vor.u32 %v3982_v33, %v3428_v34  ;;  %v3340_v43 = vld [vmem:[%s6059_s1 + $0xc8] sm:$0xf0]  ;;  %v3444_v33 = vld [vmem:[%s6059_s1 + $0x170] sm:$0xf0]  ;;  %v4130_v16 = vld [vmem:[%s6059_s1 + $0x63c] sm:$0xf0] }
  0x73   : > { %v351_v34 = vld [vmem:[%s6059_s1 + $0x228] sm:$0xff]  ;;  %v4122_v17 = vld [vmem:[%s6059_s1 + $0x604] sm:$0xf] }
  0x74   : > { %v1278_v46 = vunpack.c.h.b16 %v351_v34 }
  0x75   : > { %1045 = vmatpush.bf16.msra.mxu2 %v3115_v53  ;;  %1059 = vmatpush.bf16.msra.mxu3 %v3119_v54  ;;  %v3363_v54 = vor.u32 %v3974_v45, %v3362_v44  ;;  %v3976_v44 = vld [vmem:[%s6059_s1 + $0xec] sm:$0xf0]  ;;  %v1277_v45 = vunpack.c.l.b16 %v351_v34 }
  0x76   : > { %1540 = vmatpush.bf16.msra.mxu0 %v3347_v55  ;;  %1554 = vmatpush.bf16.msra.mxu1 %v3351_v58  ;;  %v3274_v55 = vld [vmem:[%s6059_s1 + $0x8] sm:$0xf]  ;;  %v3947_v58 = vld [vmem:[%s6059_s1 + $0xc] sm:$0xf]  ;;  %v3602_v34 = vld [vmem:[%s6059_s1 + $0x690] sm:$0xff] }
  0x77   : > { %v3275_v4 = vor.u32 %v3955_v56, %v3274_v55  ;;  %v3957_v55 = vld [vmem:[%s6059_s1 + $0x54] sm:$0xf0]  ;;  %v3383_v56 = vor.u32 %v3968_v47, %v3380_v48  ;;  %v1982_v48 = vunpack.c.l.b16 %v3602_v34 }
  0x79   : > { %1046 = vmatpush.bf16.msra.mxu2 %v3051_v5  ;;  %1060 = vmatpush.bf16.msra.mxu3 %v3055_v6  ;;  %v3279_v5 = vor.u32 %v3947_v58, %v3276_v59  ;;  %v3299_v6 = vor.u32 %v3958_v63, %v3298_v60  ;;  %v3292_v58 = vld [vmem:[%s6059_s1 + $0x58] sm:$0xf0]  ;;  %v3314_v59 = vld [vmem:[%s6059_s1 + $0x30] sm:$0xf]  ;;  %v1357_v60 = vpack.c.b16 %v1277_v45, %v1277_v45  ;;  %v3952_v63 = vld [vmem:[%s6059_s1 + $0x34] sm:$0xf] }
  0x7a   : > { %1541 = vmatpush.bf16.msra.mxu0 %v3283_v7  ;;  %1555 = vmatpush.bf16.msra.mxu1 %v3287_v8  ;;  %v3303_v7 = vor.u32 %v3950_v0, %v3300_v1  ;;  %v1449_v8 = vsel %vm794_vm0, %v1353_v61, 0  ;;  %v1358_v61 = vpack.c.b16 %v1278_v46, %v1278_v46  ;;  %v3316_v0 = vld [vmem:[%s6059_s1 + $0x70] sm:$0xf0]  ;;  %v2058_v1 = vpack.c.b16 %v1978_v49, %v1978_v49  ;;  %v3676_v45 = vld [vmem:[%s6059_s1 + $0x540] sm:$0xf0] }
  0x7b   : > { %v1983_v49 = vunpack.c.h.b16 %v3602_v34 }
  0x7c   : > { %3262 = vmatmul.msk.bf16.vlgmr.msra.gmra.mxu2 %vm790_vm1, %v4497_v22  ;;  %3263 = vmatmul.msk.bf16.vlgmr.msra.gmra.mxu3 %vm790_vm1, %v4497_v22  ;;  %v3963_v22 = vld [vmem:[%s6059_s1 + $0x8c] sm:$0xf] }
  0x7d   : > { %1509 = vmatpush.bf16.msrb.mxu2 %v1437_v9  ;;  %1523 = vmatpush.bf16.msrb.mxu3 %v1440_v10  ;;  %v3343_v53 = vor.u32 %v3963_v22, %v3340_v43  ;;  %v1452_v9 = vsel %vm794_vm0, %v1354_v62, 0  ;;  %v1467_v10 = vsel %vm794_vm0, %v1359_v2, 0  ;;  %v3443_v22 = vor.u32 %v3992_v31, %v3442_v30  ;;  %v3378_v43 = vld [vmem:[%s6059_s1 + $0xb0] sm:$0xf]  ;;  %v4114_v30 = vld [vmem:[%s6059_s1 + $0x5bc] sm:$0xf0] }
  0x7e   : > { %1593 = vmatpush.bf16.msrb.mxu0 %v1455_v11  ;;  %1607 = vmatpush.bf16.msrb.mxu1 %v1458_v12  ;;  %v1470_v11 = vsel %vm794_vm0, %v1360_v3, 0  ;;  %v3482_v12 = vld [vmem:[%s6059_s1 + $0x198] sm:$0xf]  ;;  %v3960_v62 = vld [vmem:[%s6059_s1 + $0x6c] sm:$0xf0]  ;;  %v2059_v2 = vpack.c.b16 %v1979_v50, %v1979_v50 }
  0x7f   : > { %3524 = vmatmul.msk.bf16.vlgmr.msra.gmra.mxu0 %vm790_vm1, %v4834_v18  ;;  %3525 = vmatmul.msk.bf16.vlgmr.msra.gmra.mxu1 %vm790_vm1, %v4834_v18  ;;  %v3483_v21 = vor.u32 %v4005_v13, %v3482_v12  ;;  %v4007_v12 = vld [vmem:[%s6059_s1 + $0x1e4] sm:$0xf0]  ;;  %v3999_v13 = vld [vmem:[%s6059_s1 + $0x1ac] sm:$0xf]  ;;  %v4106_v31 = vld [vmem:[%s6059_s1 + $0x584] sm:$0xf] }
  0x81   : > { %1510 = vmatpush.bf16.msrb.mxu2 %v3467_v23  ;;  %1524 = vmatpush.bf16.msrb.mxu3 %v3471_v24  ;;  %v3487_v23 = vor.u32 %v3997_v14, %v3484_v15  ;;  %v3418_v24 = vld [vmem:[%s6059_s1 + $0x118] sm:$0xf]  ;;  %v3500_v14 = vld [vmem:[%s6059_s1 + $0x1e8] sm:$0xf0]  ;;  %v3802_v15 = vld [vmem:[%s6059_s1 + $0x600] sm:$0xf] }
  0x82   : > { %1594 = vmatpush.bf16.msrb.mxu0 %v3491_v28  ;;  %1608 = vmatpush.bf16.msrb.mxu1 %v3495_v29  ;;  %v3511_v28 = vor.u32 %v4000_v19, %v3508_v20  ;;  %v3420_v29 = vld [vmem:[%s6059_s1 + $0x158] sm:$0xf0]  ;;  %v3419_v36 = vor.u32 %v3989_v25, %v3418_v24  ;;  %v3804_v19 = vld [vmem:[%s6059_s1 + $0x640] sm:$0xf0]  ;;  %v3434_v20 = vld [vmem:[%s6059_s1 + $0x128] sm:$0xf] }
  0x83   : > { %v3991_v24 = vld [vmem:[%s6059_s1 + $0x164] sm:$0xf0]  ;;  %v3983_v25 = vld [vmem:[%s6059_s1 + $0x12c] sm:$0xf] }
  0x85   : > { %1511 = vmatpush.bf16.msrb.mxu2 %v3403_v37  ;;  %1525 = vmatpush.bf16.msrb.mxu3 %v3407_v38  ;;  %v3423_v37 = vor.u32 %v3981_v26, %v3420_v29  ;;  %v3354_v38 = vld [vmem:[%s6059_s1 + $0x98] sm:$0xf]  ;;  %v3436_v26 = vld [vmem:[%s6059_s1 + $0x168] sm:$0xf0]  ;;  %v3738_v29 = vld [vmem:[%s6059_s1 + $0x580] sm:$0xf] }
  0x86   : > { %1595 = vmatpush.bf16.msrb.mxu0 %v3427_v41  ;;  %1609 = vmatpush.bf16.msrb.mxu1 %v3431_v42  ;;  %v3447_v41 = vor.u32 %v3984_v32, %v3444_v33  ;;  %v3356_v42 = vld [vmem:[%s6059_s1 + $0xd8] sm:$0xf0]  ;;  %v3355_v51 = vor.u32 %v3973_v39, %v3354_v38  ;;  %v3740_v32 = vld [vmem:[%s6059_s1 + $0x5c0] sm:$0xf0]  ;;  %v3439_v38 = vor.u32 %v3983_v25, %v3436_v26  ;;  %v3450_v25 = vld [vmem:[%s6059_s1 + $0x138] sm:$0xf] }
  0x87   : > { %v353_v33 = vld [vmem:[%s6059_s1 + $0x238] sm:$0xff]  ;;  %v3739_v39 = vor.u32 %v4114_v30, %v3738_v29 }
  0x88   : > { %v1281_v46 = vunpack.c.l.b16 %v353_v33  ;;  %v1282_v47 = vunpack.c.h.b16 %v353_v33  ;;  %v3993_v26 = vld [vmem:[%s6059_s1 + $0x174] sm:$0xf0]  ;;  %v3452_v30 = vld [vmem:[%s6059_s1 + $0x178] sm:$0xf0] }
  0x89   : > { %1512 = vmatpush.bf16.msrb.mxu2 %v3339_v52  ;;  %1526 = vmatpush.bf16.msrb.mxu3 %v3343_v53  ;;  %v3359_v52 = vor.u32 %v3965_v40, %v3356_v42  ;;  %v3379_v53 = vor.u32 %v3976_v44, %v3378_v43  ;;  %v3967_v40 = vld [vmem:[%s6059_s1 + $0xac] sm:$0xf]  ;;  %v3743_v42 = vor.u32 %v4106_v31, %v3740_v32  ;;  %v4098_v43 = vld [vmem:[%s6059_s1 + $0x53c] sm:$0xf0]  ;;  %v4090_v44 = vld [vmem:[%s6059_s1 + $0x504] sm:$0xf] }
  0x8a   : > { %1596 = vmatpush.bf16.msrb.mxu0 %v3363_v54  ;;  %1610 = vmatpush.bf16.msrb.mxu1 %v3367_v57  ;;  %v3290_v54 = vld [vmem:[%s6059_s1 + $0x18] sm:$0xf]  ;;  %v3949_v57 = vld [vmem:[%s6059_s1 + $0x1c] sm:$0xf]  ;;  %v3754_v31 = vld [vmem:[%s6059_s1 + $0x590] sm:$0xf] }
  0x8b   : > { %v3291_v3 = vor.u32 %v3957_v55, %v3290_v54  ;;  %v3306_v54 = vld [vmem:[%s6059_s1 + $0x28] sm:$0xf]  ;;  %v4116_v32 = vld [vmem:[%s6059_s1 + $0x5cc] sm:$0xf0] }
  0x8c   : > { %v3959_v55 = vld [vmem:[%s6059_s1 + $0x64] sm:$0xf0] }
  0x8d   : > { %1513 = vmatpush.bf16.msrb.mxu2 %v3275_v4  ;;  %1527 = vmatpush.bf16.msrb.mxu3 %v3279_v5  ;;  %v3295_v4 = vor.u32 %v3949_v57, %v3292_v58  ;;  %v3315_v5 = vor.u32 %v3960_v62, %v3314_v59  ;;  %v3308_v57 = vld [vmem:[%s6059_s1 + $0x68] sm:$0xf0]  ;;  %v3610_v58 = vld [vmem:[%s6059_s1 + $0x480] sm:$0xf]  ;;  %v2062_v62 = vpack.c.b16 %v1982_v48, %v1982_v48 }
  0x8e   : > { %1597 = vmatpush.bf16.msrb.mxu0 %v3299_v6  ;;  %1611 = vmatpush.bf16.msrb.mxu1 %v3303_v7  ;;  %v3319_v6 = vor.u32 %v3952_v63, %v3316_v0  ;;  %v1461_v7 = vsel %vm794_vm0, %v1357_v60, 0  ;;  %v4082_v59 = vld [vmem:[%s6059_s1 + $0x4bc] sm:$0xf0]  ;;  %v1361_v60 = vpack.c.b16 %v1281_v46, %v1281_v46  ;;  %v4074_v63 = vld [vmem:[%s6059_s1 + $0x484] sm:$0xf] }
  0x8f   : > { %v3612_v0 = vld [vmem:[%s6059_s1 + $0x4c0] sm:$0xf0]  ;;  %v3690_v46 = vld [vmem:[%s6059_s1 + $0x510] sm:$0xf] }
  0x90   : > { %3522 = vmatmul.msk.bf16.vlgmr.msrb.gmra.mxu2 %vm790_vm1, %v4834_v18  ;;  %3523 = vmatmul.msk.bf16.vlgmr.msrb.gmra.mxu3 %vm790_vm1, %v4834_v18 }
  0x91   : > { %1565 = vmatpush.bf16.msra.mxu2 %v1449_v8  ;;  %1579 = vmatpush.bf16.msra.mxu3 %v1452_v9  ;;  %v1464_v8 = vsel %vm794_vm0, %v1358_v61, 0  ;;  %v2142_v9 = vsel %vm794_vm0, %v2058_v1, 0  ;;  %v1362_v61 = vpack.c.b16 %v1282_v47, %v1282_v47  ;;  %v2063_v1 = vpack.c.b16 %v1983_v49, %v1983_v49  ;;  %v4100_v47 = vld [vmem:[%s6059_s1 + $0x54c] sm:$0xf0] }
  0x92   : > { %1649 = vmatpush.bf16.msra.mxu0 %v1467_v10  ;;  %1663 = vmatpush.bf16.msra.mxu1 %v1470_v11  ;;  %v2145_v10 = vsel %vm794_vm0, %v2059_v2, 0  ;;  %v3498_v11 = vld [vmem:[%s6059_s1 + $0x1a8] sm:$0xf]  ;;  %v3307_v2 = vor.u32 %v3959_v55, %v3306_v54 }
  0x93   : > { %3528 = vmatmul.msk.bf16.vlgmr.msrb.gmra.mxu0 %vm790_vm1, %v4834_v18  ;;  %3529 = vmatmul.msk.bf16.vlgmr.msrb.gmra.mxu1 %vm790_vm1, %v4834_v18 }
  0x95   : > { %1566 = vmatpush.bf16.msra.mxu2 %v3483_v21  ;;  %1580 = vmatpush.bf16.msra.mxu3 %v3487_v23  ;;  %v3499_v21 = vor.u32 %v4007_v12, %v3498_v11  ;;  %v3503_v23 = vor.u32 %v3999_v13, %v3500_v14  ;;  %v1703_v11 = vld [vmem:[%s4465_s20 + $0xa] sm:$0xff]  ;;  %v3514_v12 = vld [vmem:[%s6059_s1 + $0x1b8] sm:$0xf]  ;;  %v4001_v14 = vld [vmem:[%s6059_s1 + $0x1bc] sm:$0xf] }
  0x96   : > { %1650 = vmatpush.bf16.msra.mxu0 %v3507_v27  ;;  %1664 = vmatpush.bf16.msra.mxu1 %v3511_v28  ;;  %v3803_v27 = vor.u32 %v4130_v16, %v3802_v15  ;;  %v3807_v28 = vor.u32 %v4122_v17, %v3804_v19  ;;  %v4009_v13 = vld [vmem:[%s6059_s1 + $0x1f4] sm:$0xf0]  ;;  %v3516_v15 = vld [vmem:[%s6059_s1 + $0x1f8] sm:$0xf0]  ;;  %v3818_v16 = vld [vmem:[%s6059_s1 + $0x610] sm:$0xf] }
  0x97   : > { %v4132_v17 = vld [vmem:[%s6059_s1 + $0x64c] sm:$0xf0]  ;;  %v4124_v19 = vld [vmem:[%s6059_s1 + $0x614] sm:$0xf] }
  0x99   : > { %1567 = vmatpush.bf16.msra.mxu2 %v3419_v36  ;;  %1581 = vmatpush.bf16.msra.mxu3 %v3423_v37  ;;  %v3975_v36 = vld [vmem:[%s6059_s1 + $0xe4] sm:$0xf0]  ;;  %v3435_v37 = vor.u32 %v3991_v24, %v3434_v20  ;;  %v3820_v20 = vld [vmem:[%s6059_s1 + $0x650] sm:$0xf0]  ;;  %v3519_v24 = vor.u32 %v4001_v14, %v3516_v15 }
  0x9a   : > { %1651 = vmatpush.bf16.msra.mxu0 %v3443_v22  ;;  %1665 = vmatpush.bf16.msra.mxu1 %v3447_v41  ;;  %v3372_v22 = vld [vmem:[%s6059_s1 + $0xe8] sm:$0xf0]  ;;  %v3674_v41 = vld [vmem:[%s6059_s1 + $0x500] sm:$0xf]  ;;  %v3371_v50 = vor.u32 %v3975_v36, %v3370_v35  ;;  %v3823_v29 = vor.u32 %v4124_v19, %v3820_v20  ;;  %v4108_v35 = vld [vmem:[%s6059_s1 + $0x594] sm:$0xf] }
  0x9b   : > { %v3756_v36 = vld [vmem:[%s6059_s1 + $0x5d0] sm:$0xf0]  ;;  %v3810_v19 = vld [vmem:[%s6059_s1 + $0x608] sm:$0xf] }
  0x9c   : > { %v4131_v20 = vld [vmem:[%s6059_s1 + $0x644] sm:$0xf0] }
  0x9d   : > { %1568 = vmatpush.bf16.msra.mxu2 %v3355_v51  ;;  %1582 = vmatpush.bf16.msra.mxu3 %v3359_v52  ;;  %v3375_v51 = vor.u32 %v3967_v40, %v3372_v22  ;;  %v3675_v52 = vor.u32 %v4098_v43, %v3674_v41  ;;  %v3386_v22 = vld [vmem:[%s6059_s1 + $0xb8] sm:$0xf]  ;;  %v3755_v43 = vor.u32 %v4116_v32, %v3754_v31 }
  0x9e   : > { %1652 = vmatpush.bf16.msra.mxu0 %v3379_v53  ;;  %1666 = vmatpush.bf16.msra.mxu1 %v3383_v56  ;;  %v3679_v53 = vor.u32 %v4090_v44, %v3676_v45  ;;  %v3951_v56 = vld [vmem:[%s6059_s1 + $0x2c] sm:$0xf]  ;;  %v3977_v41 = vld [vmem:[%s6059_s1 + $0xf4] sm:$0xf0]  ;;  %v3759_v44 = vor.u32 %v4108_v35, %v3756_v36  ;;  %v3388_v45 = vld [vmem:[%s6059_s1 + $0xf8] sm:$0xf0]  ;;  %v3811_v31 = vor.u32 %v4131_v20, %v3810_v19 }
  0x9f   : > { %v3387_v54 = vor.u32 %v3977_v41, %v3386_v22  ;;  %v3746_v35 = vld [vmem:[%s6059_s1 + $0x588] sm:$0xf]  ;;  %v3770_v22 = vld [vmem:[%s6059_s1 + $0x5a0] sm:$0xf]  ;;  %v4078_v20 = vld [vmem:[%s6059_s1 + $0x4a4] sm:$0xf] }
  0xa0   : > { %v4115_v36 = vld [vmem:[%s6059_s1 + $0x5c4] sm:$0xf0]  ;;  %v4118_v41 = vld [vmem:[%s6059_s1 + $0x5dc] sm:$0xf0] }
  0xa1   : > { %1569 = vmatpush.bf16.msra.mxu2 %v3291_v3  ;;  %1583 = vmatpush.bf16.msra.mxu3 %v3295_v4  ;;  %v3311_v3 = vor.u32 %v3951_v56, %v3308_v57  ;;  %v3611_v4 = vor.u32 %v4082_v59, %v3610_v58  ;;  %v3691_v56 = vor.u32 %v4100_v47, %v3690_v46  ;;  %v3322_v57 = vld [vmem:[%s6059_s1 + $0x38] sm:$0xf]  ;;  %v4086_v19 = vld [vmem:[%s6059_s1 + $0x4dc] sm:$0xf0] }
  0xa2   : > { %1653 = vmatpush.bf16.msra.mxu0 %v3315_v5  ;;  %1667 = vmatpush.bf16.msra.mxu1 %v3319_v6  ;;  %v3615_v5 = vor.u32 %v4074_v63, %v3612_v0  ;;  %v1473_v6 = vsel %vm794_vm0, %v1361_v60, 0  ;;  %v3961_v58 = vld [vmem:[%s6059_s1 + $0x74] sm:$0xf0]  ;;  %v3324_v63 = vld [vmem:[%s6059_s1 + $0x78] sm:$0xf0]  ;;  %v3747_v47 = vor.u32 %v4115_v36, %v3746_v35 }
  0xa3   : > { %v3626_v0 = vld [vmem:[%s6059_s1 + $0x490] sm:$0xf]  ;;  %v3603_v46 = vld [vmem:[%s6059_s1 + $0x698] sm:$0xff] }
  0xa4   : > { %3526 = vmatmul.msk.bf16.vlgmr.msra.gmra.mxu2 %vm790_vm1, %v4834_v18  ;;  %3527 = vmatmul.msk.bf16.vlgmr.msra.gmra.mxu3 %vm790_vm1, %v4834_v18 }
  0xa5   : > { %1621 = vmatpush.bf16.msrb.mxu2 %v1461_v7  ;;  %1635 = vmatpush.bf16.msrb.mxu3 %v1464_v8  ;;  %v1476_v7 = vsel %vm794_vm0, %v1362_v61, 0  ;;  %v2154_v8 = vsel %vm794_vm0, %v2062_v62, 0  ;;  %v3953_v62 = vld [vmem:[%s6059_s1 + $0x3c] sm:$0xf] }
  0xa6   : > { %2192 = vmatpush.bf16.msrb.mxu0 %v2142_v9  ;;  %2206 = vmatpush.bf16.msrb.mxu1 %v2145_v10  ;;  %v1702_v9 = vld [vmem:[%s4465_s20 + $0x2] sm:$0xff]  ;;  %v2157_v10 = vsel %vm794_vm0, %v2063_v1, 0 }
  0xa7   : > { %3532 = vmatmul.msk.bf16.vlgmr.msra.gmra.mxu0 %vm790_vm1, %v4834_v18  ;;  %3533 = vmatmul.msk.bf16.vlgmr.msra.gmra.mxu1 %vm790_vm1, %v4834_v18 }
  0xa9   : > { %1622 = vmatpush.bf16.msrb.mxu2 %v3499_v21  ;;  %1636 = vmatpush.bf16.msrb.mxu3 %v3503_v23  ;;  %v5303_v21 = vpack.c.bf16 %v1703_v11, %v1702_v9  ;;  %v3515_v23 = vor.u32 %v4009_v13, %v3514_v12  ;;  %v3327_v11 = vor.u32 %v3953_v62, %v3324_v63  ;;  %v3708_v62 = vld [vmem:[%s6059_s1 + $0x560] sm:$0xf0] }
  0xaa   : > { %2193 = vmatpush.bf16.msrb.mxu0 %v3803_v27  ;;  %2207 = vmatpush.bf16.msrb.mxu1 %v3807_v28  ;;  %v3985_v27 = vld [vmem:[%s6059_s1 + $0x13c] sm:$0xf]  ;;  %v3819_v28 = vor.u32 %v4132_v17, %v3818_v16 }
  0xab   : > { %v3455_v40 = vor.u32 %v3985_v27, %v3452_v30  ;;  %v4126_v27 = vld [vmem:[%s6059_s1 + $0x624] sm:$0xf] }
  0xac   : > { %v5323_v33 = vpop.f32.mrf.mxu0  ;;  %v5325_v34 = vpop.f32.mrf.mxu1 }
  0xad   : > { %1623 = vmatpush.bf16.msrb.mxu2 %v3435_v37  ;;  %1637 = vmatpush.bf16.msrb.mxu3 %v3439_v38  ;;  %v3601_v37 = vld [vmem:[%s6059_s1 + $0x688] sm:$0xff]  ;;  %v3604_v38 = vld [vmem:[%s6059_s1 + $0x6a0] sm:$0xff] }
  0xae   : > { %2194 = vmatpush.bf16.msrb.mxu0 %v3739_v39  ;;  %2208 = vmatpush.bf16.msrb.mxu1 %v3743_v42  ;;  %v3451_v39 = vor.u32 %v3993_v26, %v3450_v25  ;;  %v3969_v42 = vld [vmem:[%s6059_s1 + $0xbc] sm:$0xf]  ;;  %v1980_v48 = vunpack.c.l.b16 %v3601_v37  ;;  %v1981_v49 = vunpack.c.h.b16 %v3601_v37  ;;  %v3834_v25 = vld [vmem:[%s6059_s1 + $0x620] sm:$0xf]  ;;  %v4107_v37 = vld [vmem:[%s6059_s1 + $0x58c] sm:$0xf] }
  0xaf   : > { %v3391_v55 = vor.u32 %v3969_v42, %v3388_v45  ;;  %v5377_v59 = vpop.f32.mrf.mxu2  ;;  %v5379_v60 = vpop.f32.mrf.mxu3  ;;  %v4134_v26 = vld [vmem:[%s6059_s1 + $0x65c] sm:$0xf0]  ;;  %v3772_v45 = vld [vmem:[%s6059_s1 + $0x5e0] sm:$0xf0] }
  0xb0   : > { %v2060_v1 = vpack.c.b16 %v1980_v48, %v1980_v48 }
  0xb1   : > { %1624 = vmatpush.bf16.msrb.mxu2 %v3371_v50  ;;  %1638 = vmatpush.bf16.msrb.mxu3 %v3375_v51  ;;  %v4092_v50 = vld [vmem:[%s6059_s1 + $0x514] sm:$0xf] }
  0xb2   : > { %2195 = vmatpush.bf16.msrb.mxu0 %v3675_v52  ;;  %2209 = vmatpush.bf16.msrb.mxu1 %v3679_v53  ;;  %v3692_v51 = vld [vmem:[%s6059_s1 + $0x550] sm:$0xf0]  ;;  %v1986_v52 = vunpack.c.l.b16 %v3604_v38  ;;  %v1987_v53 = vunpack.c.h.b16 %v3604_v38  ;;  %v2148_v14 = vsel %vm794_vm0, %v2060_v1, 0  ;;  %v3835_v38 = vor.u32 %v4134_v26, %v3834_v25 }
  0xb3   : > { %v3695_v61 = vor.u32 %v4092_v50, %v3692_v51  ;;  %v4099_v50 = vld [vmem:[%s6059_s1 + $0x544] sm:$0xf0]  ;;  %v4091_v51 = vld [vmem:[%s6059_s1 + $0x50c] sm:$0xf] }
  0xb4   : > { %v2067_v9 = vpack.c.b16 %v1987_v53, %v1987_v53 }
  0xb5   : > { %1625 = vmatpush.bf16.msrb.mxu2 %v3307_v2  ;;  %1639 = vmatpush.bf16.msrb.mxu3 %v3311_v3  ;;  %v2061_v2 = vpack.c.b16 %v1981_v49, %v1981_v49  ;;  %v5390_v3 = vpop.f32.mrf.mxu0  ;;  %v3682_v49 = vld [vmem:[%s6059_s1 + $0x508] sm:$0xf] }
  0xb6   : > { %2196 = vmatpush.bf16.msrb.mxu0 %v3611_v4  ;;  %2210 = vmatpush.bf16.msrb.mxu1 %v3615_v5  ;;  %v5392_v4 = vpop.f32.mrf.mxu1  ;;  %v4084_v5 = vld [vmem:[%s6059_s1 + $0x4cc] sm:$0xf0]  ;;  %v2169_v17 = vsel %vm794_vm0, %v2067_v9, 0  ;;  %v3683_v1 = vor.u32 %v4099_v50, %v3682_v49  ;;  %v3762_v50 = vld [vmem:[%s6059_s1 + $0x598] sm:$0xf] }
  0xb7   : > { %v3627_v12 = vor.u32 %v4084_v5, %v3626_v0  ;;  %v2151_v15 = vsel %vm794_vm0, %v2061_v2, 0  ;;  %v5433_v30 = vpop.f32.mrf.mxu3 }
  0xb8   : > { %3530 = vmatmul.msk.bf16.vlgmr.msrb.gmra.mxu2 %vm790_vm1, %v4834_v18  ;;  %3531 = vmatmul.msk.bf16.vlgmr.msrb.gmra.mxu3 %vm790_vm1, %v4834_v18 }
  0xb9   : > { %1677 = vmatpush.bf16.msra.mxu2 %v1473_v6  ;;  %1691 = vmatpush.bf16.msra.mxu3 %v1476_v7  ;;  %v4076_v6 = vld [vmem:[%s6059_s1 + $0x494] sm:$0xf] }
  0xba   : > { %2248 = vmatpush.bf16.msra.mxu0 %v2154_v8  ;;  %2262 = vmatpush.bf16.msra.mxu1 %v2157_v10  ;;  %v3628_v7 = vld [vmem:[%s6059_s1 + $0x4d0] sm:$0xf0]  ;;  %v2066_v8 = vpack.c.b16 %v1986_v52, %v1986_v52  ;;  %v3323_v10 = vor.u32 %v3961_v58, %v3322_v57  ;;  %v3771_v52 = vor.u32 %v4118_v41, %v3770_v22  ;;  %v1984_v57 = vunpack.c.l.b16 %v3603_v46  ;;  %v3828_v22 = vld [vmem:[%s6059_s1 + $0x658] sm:$0xf0]  ;;  %v3850_v41 = vld [vmem:[%s6059_s1 + $0x630] sm:$0xf] }
  0xbb   : > { %3864 = vmatmul.msk.bf16.vlgmr.msrb.gmra.mxu0 %vm790_vm1, %v5303_v21  ;;  %3865 = vmatmul.msk.bf16.vlgmr.msrb.gmra.mxu1 %vm790_vm1, %v5303_v21  ;;  %v3631_v13 = vor.u32 %v4076_v6, %v3628_v7  ;;  %v1985_v58 = vunpack.c.h.b16 %v3603_v46  ;;  %v3618_v6 = vld [vmem:[%s6059_s1 + $0x488] sm:$0xf]  ;;  %v3852_v46 = vld [vmem:[%s6059_s1 + $0x670] sm:$0xf0] }
  0xbc   : > { %v2166_v16 = vsel %vm794_vm0, %v2066_v8, 0  ;;  %v4083_v7 = vld [vmem:[%s6059_s1 + $0x4c4] sm:$0xf0] }
  0xbd   : > { %1678 = vmatpush.bf16.msra.mxu2 %v3515_v23  ;;  %1692 = vmatpush.bf16.msra.mxu3 %v3519_v24  ;;  %v4123_v23 = vld [vmem:[%s6059_s1 + $0x60c] sm:$0xf]  ;;  %v3619_v26 = vor.u32 %v4083_v7, %v3618_v6  ;;  %v4101_v6 = vld [vmem:[%s6059_s1 + $0x554] sm:$0xf0] }
  0xbe   : > { %2249 = vmatpush.bf16.msra.mxu0 %v3819_v28  ;;  %2263 = vmatpush.bf16.msra.mxu1 %v3823_v29  ;;  %v3812_v24 = vld [vmem:[%s6059_s1 + $0x648] sm:$0xf0]  ;;  %v3836_v28 = vld [vmem:[%s6059_s1 + $0x660] sm:$0xf0]  ;;  %v5431_v29 = vpop.f32.mrf.mxu2 }
  0xbf   : > { %v3815_v32 = vor.u32 %v4123_v23, %v3812_v24  ;;  %v3644_v23 = vld [vmem:[%s6059_s1 + $0x4e0] sm:$0xf0] }
  0xc0   : > { %v5453_v42 = vpop.f32.mrf.mxu0 }
  0xc1   : > { %1679 = vmatpush.bf16.msra.mxu2 %v3451_v39  ;;  %1693 = vmatpush.bf16.msra.mxu3 %v3455_v40  ;;  %v3839_v39 = vor.u32 %v4126_v27, %v3836_v28  ;;  %v3748_v40 = vld [vmem:[%s6059_s1 + $0x5c8] sm:$0xf0] }
  0xc2   : > { %2250 = vmatpush.bf16.msra.mxu0 %v3755_v43  ;;  %2264 = vmatpush.bf16.msra.mxu1 %v3759_v44  ;;  %v5455_v43 = vpop.f32.mrf.mxu1  ;;  %v4110_v44 = vld [vmem:[%s6059_s1 + $0x5a4] sm:$0xf]  ;;  %v3751_v48 = vor.u32 %v4107_v37, %v3748_v40  ;;  %v4125_v40 = vld [vmem:[%s6059_s1 + $0x61c] sm:$0xf] }
  0xc3   : > { %v3775_v53 = vor.u32 %v4110_v44, %v3772_v45  ;;  %v5509_v9 = vpop.f32.mrf.mxu3  ;;  %v4136_v44 = vld [vmem:[%s6059_s1 + $0x66c] sm:$0xf0]  ;;  %v4128_v45 = vld [vmem:[%s6059_s1 + $0x634] sm:$0xf]  ;;  %v3831_v49 = vor.u32 %v4125_v40, %v3828_v22 }
  0xc4   : > { %v4088_v22 = vld [vmem:[%s6059_s1 + $0x4ec] sm:$0xf0] }
  0xc5   : > { %1680 = vmatpush.bf16.msra.mxu2 %v3387_v54  ;;  %1694 = vmatpush.bf16.msra.mxu3 %v3391_v55  ;;  %v3684_v54 = vld [vmem:[%s6059_s1 + $0x548] sm:$0xf0]  ;;  %v3706_v55 = vld [vmem:[%s6059_s1 + $0x520] sm:$0xf] }
  0xc6   : > { %2251 = vmatpush.bf16.msra.mxu0 %v3691_v56  ;;  %2265 = vmatpush.bf16.msra.mxu1 %v3695_v61  ;;  %v4102_v56 = vld [vmem:[%s6059_s1 + $0x55c] sm:$0xf0]  ;;  %v4094_v61 = vld [vmem:[%s6059_s1 + $0x524] sm:$0xf]  ;;  %v3687_v2 = vor.u32 %v4091_v51, %v3684_v54  ;;  %v5507_v8 = vpop.f32.mrf.mxu2  ;;  %v4117_v51 = vld [vmem:[%s6059_s1 + $0x5d4] sm:$0xf0] }
  0xc7   : > { %v3707_v5 = vor.u32 %v4102_v56, %v3706_v55  ;;  %v4109_v54 = vld [vmem:[%s6059_s1 + $0x59c] sm:$0xf]  ;;  %v3786_v56 = vld [vmem:[%s6059_s1 + $0x5b0] sm:$0xf] }
  0xc8   : > { %v3764_v55 = vld [vmem:[%s6059_s1 + $0x5d8] sm:$0xf0] }
  0xc9   : > { %1681 = vmatpush.bf16.msra.mxu2 %v3323_v10  ;;  %1695 = vmatpush.bf16.msra.mxu3 %v3327_v11  ;;  %v3711_v10 = vor.u32 %v4094_v61, %v3708_v62  ;;  %v4075_v11 = vld [vmem:[%s6059_s1 + $0x48c] sm:$0xf]  ;;  %v4120_v61 = vld [vmem:[%s6059_s1 + $0x5ec] sm:$0xf0]  ;;  %v4112_v62 = vld [vmem:[%s6059_s1 + $0x5b4] sm:$0xf] }
  0xca   : > { %2252 = vmatpush.bf16.msra.mxu0 %v3627_v12  ;;  %2266 = vmatpush.bf16.msra.mxu1 %v3631_v13  ;;  %v3620_v12 = vld [vmem:[%s6059_s1 + $0x4c8] sm:$0xf0]  ;;  %v3642_v13 = vld [vmem:[%s6059_s1 + $0x4a0] sm:$0xf]  ;;  %v3787_v7 = vor.u32 %v4120_v61, %v3786_v56 }
  0xcb   : > { %v3623_v27 = vor.u32 %v4075_v11, %v3620_v12  ;;  %v3643_v28 = vor.u32 %v4086_v19, %v3642_v13  ;;  %v4093_v11 = vld [vmem:[%s6059_s1 + $0x51c] sm:$0xf]  ;;  %v3722_v13 = vld [vmem:[%s6059_s1 + $0x530] sm:$0xf]  ;;  %v3724_v19 = vld [vmem:[%s6059_s1 + $0x570] sm:$0xf0] }
  0xcc   : > { %3534 = vmatmul.msk.bf16.vlgmr.msra.gmra.mxu2 %vm790_vm1, %v4834_v18  ;;  %3535 = vmatmul.msk.bf16.vlgmr.msra.gmra.mxu3 %vm790_vm1, %v4834_v18  ;;  %v3606_v18 = vld [vmem:[%s6059_s1 + $0x6b0] sm:$0xff]  ;;  %v3700_v12 = vld [vmem:[%s6059_s1 + $0x558] sm:$0xf0]  ;;  %v4127_v56 = vld [vmem:[%s6059_s1 + $0x62c] sm:$0xf] }
  0xcd   : > { %2220 = vmatpush.bf16.msrb.mxu2 %v2148_v14  ;;  %2234 = vmatpush.bf16.msrb.mxu3 %v2151_v15  ;;  %v1990_v63 = vunpack.c.l.b16 %v3606_v18  ;;  %v1991_v0 = vunpack.c.h.b16 %v3606_v18  ;;  %v2064_v14 = vpack.c.b16 %v1984_v57, %v1984_v57  ;;  %v2065_v15 = vpack.c.b16 %v1985_v58, %v1985_v58  ;;  %v3844_v61 = vld [vmem:[%s6059_s1 + $0x668] sm:$0xf0] }
  0xce   : > { %2304 = vmatpush.bf16.msrb.mxu0 %v2166_v16  ;;  %2318 = vmatpush.bf16.msrb.mxu1 %v2169_v17  ;;  %v5520_v16 = vpop.f32.mrf.mxu0  ;;  %v5522_v17 = vpop.f32.mrf.mxu1 }
  0xcf   : > { %3868 = vmatmul.msk.bf16.vlgmr.msra.gmra.mxu0 %vm790_vm1, %v5303_v21  ;;  %3869 = vmatmul.msk.bf16.vlgmr.msra.gmra.mxu1 %vm790_vm1, %v5303_v21  ;;  %v2070_v24 = vpack.c.b16 %v1990_v63, %v1990_v63  ;;  %v2071_v25 = vpack.c.b16 %v1991_v0, %v1991_v0  ;;  %v2163_v35 = vsel %vm794_vm0, %v2065_v15, 0  ;;  %v5561_v18 = vpop.f32.mrf.mxu2  ;;  %v3788_v63 = vld [vmem:[%s6059_s1 + $0x5f0] sm:$0xf0]  ;;  %v3605_v0 = vld [vmem:[%s6059_s1 + $0x6a8] sm:$0xff] }
  0xd0   : > { %v4096_v15 = vld [vmem:[%s6059_s1 + $0x534] sm:$0xf] }
  0xd1   : > { %2221 = vmatpush.bf16.msrb.mxu2 %v3811_v31  ;;  %2235 = vmatpush.bf16.msrb.mxu3 %v3815_v32  ;;  %v3647_v31 = vor.u32 %v4078_v20, %v3644_v23  ;;  %v2160_v32 = vsel %vm794_vm0, %v2064_v14, 0  ;;  %v2178_v36 = vsel %vm794_vm0, %v2070_v24, 0  ;;  %v2181_v37 = vsel %vm794_vm0, %v2071_v25, 0  ;;  %v4104_v14 = vld [vmem:[%s6059_s1 + $0x56c] sm:$0xf0] }
  0xd2   : > { %2305 = vmatpush.bf16.msrb.mxu0 %v3835_v38  ;;  %2319 = vmatpush.bf16.msrb.mxu1 %v3839_v39  ;;  %v3826_v38 = vld [vmem:[%s6059_s1 + $0x618] sm:$0xf]  ;;  %v1988_v20 = vunpack.c.l.b16 %v3605_v0  ;;  %v1989_v23 = vunpack.c.h.b16 %v3605_v0  ;;  %v3703_v25 = vor.u32 %v4093_v11, %v3700_v12  ;;  %v3780_v11 = vld [vmem:[%s6059_s1 + $0x5e8] sm:$0xf0] }
  0xd3   : > { %v4133_v39 = vld [vmem:[%s6059_s1 + $0x654] sm:$0xf0] }
  0xd5   : > { %2222 = vmatpush.bf16.msrb.mxu2 %v3747_v47  ;;  %2236 = vmatpush.bf16.msrb.mxu3 %v3751_v48  ;;  %v5563_v47 = vpop.f32.mrf.mxu3  ;;  %v3827_v48 = vor.u32 %v4133_v39, %v3826_v38  ;;  %v3658_v38 = vld [vmem:[%s6059_s1 + $0x4b0] sm:$0xf] }
  0xd6   : > { %2306 = vmatpush.bf16.msrb.mxu0 %v3771_v52  ;;  %2320 = vmatpush.bf16.msrb.mxu1 %v3775_v53  ;;  %v3851_v52 = vor.u32 %v4136_v44, %v3850_v41  ;;  %v3855_v53 = vor.u32 %v4128_v45, %v3852_v46  ;;  %v5580_v57 = vpop.f32.mrf.mxu0  ;;  %v5582_v58 = vpop.f32.mrf.mxu1  ;;  %v4080_v41 = vld [vmem:[%s6059_s1 + $0x4b4] sm:$0xf]  ;;  %v2068_v45 = vpack.c.b16 %v1988_v20, %v1988_v20  ;;  %v3714_v20 = vld [vmem:[%s6059_s1 + $0x528] sm:$0xf] }
  0xd7   : > { %v3660_v44 = vld [vmem:[%s6059_s1 + $0x4f0] sm:$0xf0]  ;;  %v2069_v46 = vpack.c.b16 %v1989_v23, %v1989_v23  ;;  %v3716_v23 = vld [vmem:[%s6059_s1 + $0x568] sm:$0xf0] }
  0xd9   : > { %2223 = vmatpush.bf16.msrb.mxu2 %v3683_v1  ;;  %2237 = vmatpush.bf16.msrb.mxu3 %v3687_v2  ;;  %v3763_v1 = vor.u32 %v4117_v51, %v3762_v50  ;;  %v3767_v2 = vor.u32 %v4109_v54, %v3764_v55  ;;  %v3659_v50 = vor.u32 %v4088_v22, %v3658_v38  ;;  %v3842_v54 = vld [vmem:[%s6059_s1 + $0x628] sm:$0xf] }
  0xda   : > { %2307 = vmatpush.bf16.msrb.mxu0 %v3707_v5  ;;  %2321 = vmatpush.bf16.msrb.mxu1 %v3711_v10  ;;  %v3698_v5 = vld [vmem:[%s6059_s1 + $0x518] sm:$0xf]  ;;  %v3791_v10 = vor.u32 %v4112_v62, %v3788_v63  ;;  %v3663_v51 = vor.u32 %v4080_v41, %v3660_v44  ;;  %v4135_v55 = vld [vmem:[%s6059_s1 + $0x664] sm:$0xf0]  ;;  %v4079_v41 = vld [vmem:[%s6059_s1 + $0x4ac] sm:$0xf] }
  0xdb   : > { %v3699_v24 = vor.u32 %v4101_v6, %v3698_v5  ;;  %v3843_v0 = vor.u32 %v4135_v55, %v3842_v54  ;;  %v4087_v22 = vld [vmem:[%s6059_s1 + $0x4e4] sm:$0xf0]  ;;  %v3652_v44 = vld [vmem:[%s6059_s1 + $0x4e8] sm:$0xf0]  ;;  %v3858_v54 = vld [vmem:[%s6059_s1 + $0x638] sm:$0xf] }
  0xdc   : > { %v3860_v55 = vld [vmem:[%s6059_s1 + $0x678] sm:$0xf0] }
  0xdd   : > { %2224 = vmatpush.bf16.msrb.mxu2 %v3619_v26  ;;  %2238 = vmatpush.bf16.msrb.mxu3 %v3623_v27  ;;  %v5628_v26 = vpop.f32.mrf.mxu2  ;;  %v3634_v27 = vld [vmem:[%s6059_s1 + $0x498] sm:$0xf] }
  0xde   : > { %2308 = vmatpush.bf16.msrb.mxu0 %v3643_v28  ;;  %2322 = vmatpush.bf16.msrb.mxu1 %v3647_v31  ;;  %v4085_v28 = vld [vmem:[%s6059_s1 + $0x4d4] sm:$0xf0]  ;;  %v5636_v31 = vpop.f32.mrf.mxu3  ;;  %v5647_v39 = vpop.f32.mrf.mxu0 }
  0xdf   : > { %v5649_v40 = vpop.f32.mrf.mxu1 }
  0xe0   : > { %3866 = vmatmul.msk.bf16.vlgmr.msrb.gmra.mxu2 %vm790_vm1, %v5303_v21  ;;  %3867 = vmatmul.msk.bf16.vlgmr.msrb.gmra.mxu3 %vm790_vm1, %v5303_v21 }
  0xe1   : > { %2276 = vmatpush.bf16.msra.mxu2 %v2160_v32  ;;  %2290 = vmatpush.bf16.msra.mxu3 %v2163_v35  ;;  %v3723_v32 = vor.u32 %v4104_v14, %v3722_v13  ;;  %v3727_v35 = vor.u32 %v4096_v15, %v3724_v19  ;;  %v3607_v14 = vld [vmem:[%s6059_s1 + $0x6b8] sm:$0xff] }
  0xe2   : > { %2360 = vmatpush.bf16.msra.mxu0 %v2178_v36  ;;  %2374 = vmatpush.bf16.msra.mxu1 %v2181_v37  ;;  %v4077_v36 = vld [vmem:[%s6059_s1 + $0x49c] sm:$0xf] }
  0xe3   : > { %3872 = vmatmul.msk.bf16.vlgmr.msrb.gmra.mxu0 %vm790_vm1, %v5303_v21  ;;  %3873 = vmatmul.msk.bf16.vlgmr.msrb.gmra.mxu1 %vm790_vm1, %v5303_v21  ;;  %v3636_v37 = vld [vmem:[%s6059_s1 + $0x4d8] sm:$0xf0] }
  0xe5   : > { %2277 = vmatpush.bf16.msra.mxu2 %v3827_v48  ;;  %2291 = vmatpush.bf16.msra.mxu3 %v3831_v49  ;;  %v3635_v48 = vor.u32 %v4085_v28, %v3634_v27  ;;  %v3639_v49 = vor.u32 %v4077_v36, %v3636_v37  ;;  %v5674_v62 = vpop.f32.mrf.mxu2  ;;  %v3650_v36 = vld [vmem:[%s6059_s1 + $0x4a8] sm:$0xf] }
  0xe6   : > { %2361 = vmatpush.bf16.msra.mxu0 %v3851_v52  ;;  %2375 = vmatpush.bf16.msra.mxu1 %v3855_v53  ;;  %v2172_v52 = vsel %vm794_vm0, %v2068_v45, 0  ;;  %v2175_v53 = vsel %vm794_vm0, %v2069_v46, 0  ;;  %v5676_v63 = vpop.f32.mrf.mxu3 }
  0xe8   : > { %v1487_v5 = vpop.f32.mrf.mxu0  ;;  %v1501_v6 = vpop.f32.mrf.mxu1 }
  0xe9   : > { %2278 = vmatpush.bf16.msra.mxu2 %v3763_v1  ;;  %2292 = vmatpush.bf16.msra.mxu3 %v3767_v2  ;;  %v3847_v1 = vor.u32 %v4127_v56, %v3844_v61  ;;  %v3778_v2 = vld [vmem:[%s6059_s1 + $0x5a8] sm:$0xf]  ;;  %v5699_v12 = vadd.f32 %v1487_v5, %v5377_v59  ;;  %v5702_v13 = vadd.f32 %v1501_v6, %v5379_v60  ;;  %v4095_v60 = vld [vmem:[%s6059_s1 + $0x52c] sm:$0xf]  ;;  %v4121_v5 = vld [vmem:[%s6059_s1 + $0x5f4] sm:$0xf0] }
  0xea   : > { %2362 = vmatpush.bf16.msra.mxu0 %v3787_v7  ;;  %2376 = vmatpush.bf16.msra.mxu1 %v3791_v10  ;;  %v4119_v7 = vld [vmem:[%s6059_s1 + $0x5e4] sm:$0xf0]  ;;  %v4111_v10 = vld [vmem:[%s6059_s1 + $0x5ac] sm:$0xf]  ;;  %v3719_v28 = vor.u32 %v4095_v60, %v3716_v23  ;;  %v4113_v6 = vld [vmem:[%s6059_s1 + $0x5bc] sm:$0xf] }
  0xeb   : > { %v3779_v15 = vor.u32 %v4119_v7, %v3778_v2  ;;  %v3783_v19 = vor.u32 %v4111_v10, %v3780_v11  ;;  %v4103_v59 = vld [vmem:[%s6059_s1 + $0x564] sm:$0xf0]  ;;  %v3794_v2 = vld [vmem:[%s6059_s1 + $0x5b8] sm:$0xf]  ;;  %v3796_v7 = vld [vmem:[%s6059_s1 + $0x5f8] sm:$0xf0] }
  0xec   : > { %v3715_v27 = vor.u32 %v4103_v59, %v3714_v20  ;;  %v4105_v20 = vld [vmem:[%s6059_s1 + $0x574] sm:$0xf0]  ;;  %v4097_v59 = vld [vmem:[%s6059_s1 + $0x53c] sm:$0xf] }
  0xed   : > { %2279 = vmatpush.bf16.msra.mxu2 %v3699_v24  ;;  %2293 = vmatpush.bf16.msra.mxu3 %v3703_v25  ;;  %v1992_v24 = vunpack.c.l.b16 %v3607_v14  ;;  %v1993_v25 = vunpack.c.h.b16 %v3607_v14  ;;  %v3795_v14 = vor.u32 %v4121_v5, %v3794_v2  ;;  %v3732_v60 = vld [vmem:[%s6059_s1 + $0x578] sm:$0xf0] }
  0xee   : > { %2363 = vmatpush.bf16.msra.mxu0 %v3723_v32  ;;  %2377 = vmatpush.bf16.msra.mxu1 %v3727_v35  ;;  %v5719_v32 = vpop.f32.mrf.mxu2  ;;  %v5721_v35 = vpop.f32.mrf.mxu3 }
  0xef   : > { %v2072_v45 = vpack.c.b16 %v1992_v24, %v1992_v24  ;;  %v2073_v46 = vpack.c.b16 %v1993_v25, %v1993_v25  ;;  %v3735_v24 = vor.u32 %v4097_v59, %v3732_v60 }
  0xf0   : > { %v1489_v37 = vpop.f32.mrf.mxu0  ;;  %v1503_v38 = vpop.f32.mrf.mxu1 }
  0xf1   : > { %2280 = vmatpush.bf16.msra.mxu2 %v3635_v48  ;;  %2294 = vmatpush.bf16.msra.mxu3 %v3639_v49  ;;  %v5736_v48 = vadd.f32 %v1489_v37, %v5431_v29  ;;  %v5739_v49 = vadd.f32 %v1503_v38, %v5433_v30  ;;  %v4137_v29 = vld [vmem:[%s6059_s1 + $0x674] sm:$0xf0]  ;;  %v4129_v30 = vld [vmem:[%s6059_s1 + $0x63c] sm:$0xf] }
  0xf2   : > { %2364 = vmatpush.bf16.msra.mxu0 %v3659_v50  ;;  %2378 = vmatpush.bf16.msra.mxu1 %v3663_v51  ;;  %v3651_v50 = vor.u32 %v4087_v22, %v3650_v36  ;;  %v3655_v51 = vor.u32 %v4079_v41, %v3652_v44  ;;  %v4089_v36 = vld [vmem:[%s6059_s1 + $0x4f4] sm:$0xf0]  ;;  %v4081_v37 = vld [vmem:[%s6059_s1 + $0x4bc] sm:$0xf] }
  0xf3   : > { %v3668_v38 = vld [vmem:[%s6059_s1 + $0x4f8] sm:$0xf0] }
  0xf4   : > { %3870 = vmatmul.msk.bf16.vlgmr.msra.gmra.mxu2 %vm790_vm1, %v5303_v21  ;;  %3871 = vmatmul.msk.bf16.vlgmr.msra.gmra.mxu3 %vm790_vm1, %v5303_v21 }
  0xf5   : > { %2332 = vmatpush.bf16.msrb.mxu2 %v2172_v52  ;;  %2346 = vmatpush.bf16.msrb.mxu3 %v2175_v53  ;;  %v2184_v52 = vsel %vm794_vm0, %v2072_v45, 0  ;;  %v2187_v53 = vsel %vm794_vm0, %v2073_v46, 0 }
  0xf6   : > { %3876 = vmatmul.msk.bf16.vlgmr.msra.gmra.mxu0 %vm790_vm1, %v5303_v21  ;;  %3877 = vmatmul.msk.bf16.vlgmr.msra.gmra.mxu1 %vm790_vm1, %v5303_v21  ;;  %v5755_v56 = vpop.f32.mrf.mxu2  ;;  %v5757_v61 = vpop.f32.mrf.mxu3 }
  0xf9   : > { %2333 = vmatpush.bf16.msrb.mxu2 %v3843_v0  ;;  %2347 = vmatpush.bf16.msrb.mxu3 %v3847_v1  ;;  %v3859_v0 = vor.u32 %v4137_v29, %v3858_v54  ;;  %v3863_v1 = vor.u32 %v4129_v30, %v3860_v55 }
  0xfc   : > { %v5775_v10 = vpop.f32.mrf.mxu0  ;;  %v5777_v11 = vpop.f32.mrf.mxu1 }
  0xfd   : > { %2334 = vmatpush.bf16.msrb.mxu2 %v3779_v15  ;;  %2348 = vmatpush.bf16.msrb.mxu3 %v3783_v19  ;;  %v3799_v15 = vor.u32 %v4113_v6, %v3796_v7  ;;  %v3730_v19 = vld [vmem:[%s6059_s1 + $0x538] sm:$0xf] }
  0xfe   : > { %v3731_v23 = vor.u32 %v4105_v20, %v3730_v19 }
  0xff   : > { %v5791_v25 = vpop.f32.mrf.mxu2 }
 0x101   : > { %2335 = vmatpush.bf16.msrb.mxu2 %v3715_v27  ;;  %2349 = vmatpush.bf16.msrb.mxu3 %v3719_v28  ;;  %v3666_v27 = vld [vmem:[%s6059_s1 + $0x4b8] sm:$0xf]  ;;  %v5796_v28 = vpop.f32.mrf.mxu3 }
 0x102   : > { %v3667_v46 = vor.u32 %v4089_v36, %v3666_v27 }
 0x104   : > { %v1545_v22 = vpop.f32.mrf.mxu0  ;;  %v1559_v44 = vpop.f32.mrf.mxu1 }
 0x105   : > { %2336 = vmatpush.bf16.msrb.mxu2 %v3651_v50  ;;  %2350 = vmatpush.bf16.msrb.mxu3 %v3655_v51  ;;  %v5808_v41 = vadd.f32 %v1545_v22, %v5390_v3  ;;  %v5811_v45 = vadd.f32 %v1559_v44, %v5392_v4  ;;  %v3671_v50 = vor.u32 %v4081_v37, %v3668_v38 }
 0x107   : > { %v5813_v51 = vpop.f32.mrf.mxu2 }
 0x108   : > { %3874 = vmatmul.msk.bf16.vlgmr.msrb.gmra.mxu2 %vm790_vm1, %v5303_v21  ;;  %3875 = vmatmul.msk.bf16.vlgmr.msrb.gmra.mxu3 %vm790_vm1, %v5303_v21 }
 0x109   : > { %2388 = vmatpush.bf16.msra.mxu2 %v2184_v52  ;;  %2402 = vmatpush.bf16.msra.mxu3 %v2187_v53  ;;  %v5815_v52 = vpop.f32.mrf.mxu3 }
 0x10d   : > { %2389 = vmatpush.bf16.msra.mxu2 %v3859_v0  ;;  %2403 = vmatpush.bf16.msra.mxu3 %v3863_v1 }
 0x110   : > { %v5821_v3 = vpop.f32.mrf.mxu0  ;;  %v5823_v53 = vpop.f32.mrf.mxu1 }
 0x111   : > { %2390 = vmatpush.bf16.msra.mxu2 %v3795_v14  ;;  %2404 = vmatpush.bf16.msra.mxu3 %v3799_v15 }
 0x113   : > { %v1515_v4 = vpop.f32.mrf.mxu2  ;;  %v1529_v54 = vpop.f32.mrf.mxu3 }
 0x114   : > { %v5826_v29 = vadd.f32 %v1515_v4, %v5507_v8  ;;  %v5829_v30 = vadd.f32 %v1529_v54, %v5509_v9 }
 0x115   : > { %2391 = vmatpush.bf16.msra.mxu2 %v3731_v23  ;;  %2405 = vmatpush.bf16.msra.mxu3 %v3735_v24 }
 0x118   : > { %v1601_v55 = vpop.f32.mrf.mxu0  ;;  %v1615_v0 = vpop.f32.mrf.mxu1 }
 0x119   : > { %2392 = vmatpush.bf16.msra.mxu2 %v3667_v46  ;;  %2406 = vmatpush.bf16.msra.mxu3 %v3671_v50  ;;  %v5832_v1 = vadd.f32 %v1601_v55, %v5520_v16  ;;  %v5835_v2 = vadd.f32 %v1615_v0, %v5522_v17 }
 0x11b   : > { %v1531_v5 = vpop.f32.mrf.mxu3 }
 0x11c   : > { %3878 = vmatmul.msk.bf16.vlgmr.msra.gmra.mxu2 %vm790_vm1, %v5303_v21  ;;  %3879 = vmatmul.msk.bf16.vlgmr.msra.gmra.mxu3 %vm790_vm1, %v5303_v21  ;;  %v1517_v21 = vpop.f32.mrf.mxu2  ;;  %v5841_v7 = vadd.f32 %v1531_v5, %v5563_v47 }
 0x11d   : > { %v5838_v6 = vadd.f32 %v1517_v21, %v5561_v18 }
 0x124   : > { %v5843_v8 = vpop.f32.mrf.mxu0  ;;  %v5845_v9 = vpop.f32.mrf.mxu1 }
 0x127   : > { %v1571_v14 = vpop.f32.mrf.mxu2  ;;  %v1585_v15 = vpop.f32.mrf.mxu3 }
 0x128   : > { %v5848_v16 = vadd.f32 %v1571_v14, %v5628_v26  ;;  %v5851_v17 = vadd.f32 %v1585_v15, %v5636_v31  ;;  %v5866_v26 = vld [vmem:[%s6060_s2] sm:$0xff] }
 0x129   : > { %v2447_v27 = vperm.slane %v5866_v26, 0  ;;  %v2448_v37 = vperm.slane %v5866_v26, 1 }
 0x12c   : > { %v5853_v19 = vpop.f32.mrf.mxu0  ;;  %v5855_v20 = vpop.f32.mrf.mxu1 }
 0x12f   : > { %v1573_v18 = vpop.f32.mrf.mxu2  ;;  %v1587_v59 = vpop.f32.mrf.mxu3 }
 0x130   : > { %v5858_v47 = vadd.f32 %v1573_v18, %v5674_v62  ;;  %v5861_v60 = vadd.f32 %v1587_v59, %v5676_v63 }
 0x138   : > { %v2198_v23 = vpop.f32.mrf.mxu0  ;;  %v2212_v24 = vpop.f32.mrf.mxu1 }
 0x139   : > { %v2413_v31 = vadd.f32 %v2198_v23, %v5699_v12  ;;  %v2414_v36 = vadd.f32 %v2212_v24, %v5702_v13 }
 0x13b   : > { %v1627_v62 = vpop.f32.mrf.mxu2  ;;  %v1641_v38 = vpop.f32.mrf.mxu3  ;;  %v2479_v50 = vadd.f32 %v2447_v27, %v2413_v31  ;;  %v2480_v4 = vadd.f32 %v2448_v37, %v2414_v36 }
 0x13c   : > { %v5873_v63 = vadd.f32 %v1627_v62, %v5719_v32  ;;  %v5876_v22 = vadd.f32 %v1641_v38, %v5721_v35  ;;  %v1558_v62 = vadd.f32 %v5777_v11, %v5325_v34 }
 0x13d   : > { %v2511_v0 = vmax.f32 %v2479_v50, 0.0  ;;  %v2512_v21 = vmax.f32 %v2480_v4, 0.0  ;;  %v2452_v50 = vperm.slane %v5866_v26, 5 }
 0x140   : > { %v2200_v44 = vpop.f32.mrf.mxu0  ;;  %v2214_v46 = vpop.f32.mrf.mxu1 }
 0x141   : > { %v2429_v12 = vadd.f32 %v2200_v44, %v5736_v48  ;;  %v2430_v54 = vadd.f32 %v2214_v46, %v5739_v49 }
 0x143   : > { %v2495_v55 = vadd.f32 %v2447_v27, %v2429_v12  ;;  %v2496_v13 = vadd.f32 %v2448_v37, %v2430_v54  ;;  %v1629_v15 = vpop.f32.mrf.mxu2  ;;  %v1643_v32 = vpop.f32.mrf.mxu3  ;;  %v1544_v37 = vadd.f32 %v5775_v10, %v5323_v33 }
 0x144   : > { %v5881_v18 = vadd.f32 %v1629_v15, %v5755_v56  ;;  %v5884_v35 = vadd.f32 %v1643_v32, %v5757_v61  ;;  %v2451_v61 = vperm.slane %v5866_v26, 4 }
 0x145   : > { %v2527_v5 = vmax.f32 %v2495_v55, 0.0  ;;  %v2528_v14 = vmax.f32 %v2496_v13, 0.0 }
 0x147   : > { %v2543_v59 = vadd.f32 %v2527_v5, %v2511_v0  ;;  %v2550_v23 = vadd.f32 %v2528_v14, %v2512_v21 }
 0x149   : > { %v2544_v24 = vrot.slane %v2543_v59, 4  ;;  %v2551_v48 = vrot.slane %v2550_v23, 4 }
 0x14b   : > { %v2545_v27 = vadd.f32 %v2544_v24, %v2543_v59  ;;  %v2552_v36 = vadd.f32 %v2551_v48, %v2550_v23 }
 0x14c   : > { %v2254_v31 = vpop.f32.mrf.mxu0  ;;  %v2268_v49 = vpop.f32.mrf.mxu1 }
 0x14d   : > { %v2546_v38 = vrot.slane %v2545_v27, 2  ;;  %v2553_v56 = vrot.slane %v2552_v36, 2  ;;  %v2417_v44 = vadd.f32 %v2254_v31, %v1544_v37  ;;  %v2418_v46 = vadd.f32 %v2268_v49, %v1558_v62 }
 0x14f   : > { %v2547_v4 = vadd.f32 %v2546_v38, %v2545_v27  ;;  %v2554_v12 = vadd.f32 %v2553_v56, %v2552_v36  ;;  %v5892_v54 = vpop.f32.mrf.mxu2  ;;  %v1697_v55 = vpop.f32.mrf.mxu3  ;;  %v2483_v0 = vadd.f32 %v2451_v61, %v2417_v44  ;;  %v2484_v34 = vadd.f32 %v2452_v50, %v2418_v46 }
 0x150   : > { %v5895_v13 = vadd.f32 %v1697_v55, %v5796_v28  ;;  %v1614_v44 = vadd.f32 %v5823_v53, %v5455_v43  ;;  %v2449_v43 = vperm.slane %v5866_v26, 2  ;;  %v2450_v53 = vperm.slane %v5866_v26, 3 }
 0x151   : > { %v2548_v33 = vrot.slane %v2547_v4, 1  ;;  %v2555_v10 = vrot.slane %v2554_v12, 1  ;;  %v2515_v48 = vmax.f32 %v2483_v0, 0.0  ;;  %v2516_v31 = vmax.f32 %v2484_v34, 0.0 }
 0x153   : > { %v2549_v5 = vadd.f32 %v2548_v33, %v2547_v4  ;;  %v2556_v14 = vadd.f32 %v2555_v10, %v2554_v12 }
 0x154   : > { %v2256_v11 = vpop.f32.mrf.mxu0  ;;  %v2270_v21 = vpop.f32.mrf.mxu1 }
 0x155   : > { %v2433_v15 = vadd.f32 %v2256_v11, %v5808_v41  ;;  %v2434_v32 = vadd.f32 %v2270_v21, %v5811_v45  ;;  %v5899_v59 = vadd.f32 %v2556_v14, %v2549_v5  ;;  %v5908_v41 = vld [vmem:[%s6060_s2 + $0x8] sm:$0xff]  ;;  %v1600_v45 = vadd.f32 %v5821_v3, %v5453_v42 }
 0x156   : > { %v2455_v46 = vperm.slane %v5908_v41, 0  ;;  %v2456_v4 = vperm.slane %v5908_v41, 1 }
 0x157   : > { %v2499_v23 = vadd.f32 %v2451_v61, %v2433_v15  ;;  %v2500_v24 = vadd.f32 %v2452_v50, %v2434_v32  ;;  %v5901_v27 = vpop.f32.mrf.mxu2  ;;  %v5903_v36 = vpop.f32.mrf.mxu3 }
 0x159   : > { %v2531_v28 = vmax.f32 %v2499_v23, 0.0  ;;  %v2532_v49 = vmax.f32 %v2500_v24, 0.0 }
 0x15b   : > { %v2571_v37 = vadd.f32 %v2531_v28, %v2515_v48  ;;  %v2578_v62 = vadd.f32 %v2532_v49, %v2516_v31 }
 0x15d   : > { %v2572_v15 = vrot.slane %v2571_v37, 4 }
 0x160   : > { %v2310_v38 = vpop.f32.mrf.mxu0  ;;  %v2324_v56 = vpop.f32.mrf.mxu1 }
 0x161   : > { %v2421_v61 = vadd.f32 %v2310_v38, %v1600_v45  ;;  %v2422_v50 = vadd.f32 %v2324_v56, %v1614_v44  ;;  %v2573_v44 = vadd.f32 %v2572_v15, %v2571_v37 }
 0x163   : > { %v2226_v12 = vpop.f32.mrf.mxu2  ;;  %v2240_v55 = vpop.f32.mrf.mxu3  ;;  %v2487_v0 = vadd.f32 %v2455_v46, %v2421_v61  ;;  %v2488_v34 = vadd.f32 %v2456_v4, %v2422_v50  ;;  %v2579_v61 = vrot.slane %v2578_v62, 4  ;;  %v2574_v37 = vrot.slane %v2573_v44, 2 }
 0x164   : > { %v2415_v42 = vadd.f32 %v2226_v12, %v5826_v29  ;;  %v2416_v3 = vadd.f32 %v2240_v55, %v5829_v30 }
 0x165   : > { %v2519_v32 = vmax.f32 %v2487_v0, 0.0  ;;  %v2520_v23 = vmax.f32 %v2488_v34, 0.0  ;;  %v2459_v34 = vperm.slane %v5908_v41, 4  ;;  %v2575_v15 = vadd.f32 %v2574_v37, %v2573_v44 }
 0x166   : > { %v2482_v49 = vadd.f32 %v2450_v53, %v2416_v3 }
 0x167   : > { %v2576_v44 = vrot.slane %v2575_v15, 1 }
 0x168   : > { %v2312_v33 = vpop.f32.mrf.mxu0  ;;  %v2326_v10 = vpop.f32.mrf.mxu1  ;;  %v2514_v12 = vmax.f32 %v2482_v49, 0.0 }
 0x169   : > { %v2437_v11 = vadd.f32 %v2312_v33, %v5832_v1  ;;  %v2438_v21 = vadd.f32 %v2326_v10, %v5835_v2  ;;  %v2481_v1 = vadd.f32 %v2449_v43, %v2415_v42  ;;  %v1656_v10 = vadd.f32 %v5843_v8, %v5580_v57 }
 0x16a   : > { %v1658_v57 = vadd.f32 %v5853_v19, %v5647_v39 }
 0x16b   : > { %v2503_v5 = vadd.f32 %v2455_v46, %v2437_v11  ;;  %v2504_v14 = vadd.f32 %v2456_v4, %v2438_v21  ;;  %v2228_v31 = vpop.f32.mrf.mxu2  ;;  %v2242_v28 = vpop.f32.mrf.mxu3  ;;  %v2513_v4 = vmax.f32 %v2481_v1, 0.0  ;;  %v2460_v11 = vperm.slane %v5908_v41, 5 }
 0x16c   : > { %v2431_v2 = vadd.f32 %v2228_v31, %v5838_v6  ;;  %v2432_v29 = vadd.f32 %v2242_v28, %v5841_v7  ;;  %v1670_v6 = vadd.f32 %v5845_v9, %v5582_v58  ;;  %v2580_v21 = vadd.f32 %v2579_v61, %v2578_v62 }
 0x16d   : > { %v2535_v24 = vmax.f32 %v2503_v5, 0.0  ;;  %v2536_v48 = vmax.f32 %v2504_v14, 0.0  ;;  %v1672_v58 = vadd.f32 %v5855_v20, %v5649_v40  ;;  %v2454_v40 = vperm.slane %v5866_v26, 7 }
 0x16e   : > { %v2497_v56 = vadd.f32 %v2449_v43, %v2431_v2  ;;  %v2498_v45 = vadd.f32 %v2450_v53, %v2432_v29  ;;  %v2453_v29 = vperm.slane %v5866_v26, 6 }
 0x16f   : > { %v5924_v38 = vadd.f32 %v2535_v24, %v2519_v32  ;;  %v5926_v30 = vadd.f32 %v2536_v48, %v2520_v23  ;;  %v2581_v32 = vrot.slane %v2580_v21, 2 }
 0x170   : > { %v2529_v55 = vmax.f32 %v2497_v56, 0.0  ;;  %v2530_v33 = vmax.f32 %v2498_v45, 0.0 }
 0x171   : > { %v2582_v61 = vadd.f32 %v2581_v32, %v2580_v21 }
 0x172   : > { %v2557_v7 = vadd.f32 %v2529_v55, %v2513_v4  ;;  %v2564_v0 = vadd.f32 %v2530_v33, %v2514_v12  ;;  %v4145_v4 = vld [vmem:[%s6061_s3 + $0x38] sm:$0xff] }
 0x173   : > { %v2366_v46 = vpop.f32.mrf.mxu0  ;;  %v2380_v50 = vpop.f32.mrf.mxu1  ;;  %2753 = vmatpush.bf16.msrb.mxu0 %v4145_v4 }
 0x174   : > { %v2425_v42 = vadd.f32 %v2366_v46, %v1656_v10  ;;  %v2426_v43 = vadd.f32 %v2380_v50, %v1670_v6  ;;  %v2558_v3 = vrot.slane %v2557_v7, 4  ;;  %v2565_v53 = vrot.slane %v2564_v0, 4 }
 0x176   : > { %v2559_v8 = vadd.f32 %v2558_v3, %v2557_v7  ;;  %v2566_v9 = vadd.f32 %v2565_v53, %v2564_v0  ;;  %v2491_v23 = vadd.f32 %v2459_v34, %v2425_v42  ;;  %v2492_v24 = vadd.f32 %v2460_v11, %v2426_v43  ;;  %v4144_v3 = vld [vmem:[%s6061_s3 + $0x30] sm:$0xff] }
 0x177   : > { %v2282_v5 = vpop.f32.mrf.mxu2  ;;  %v2296_v14 = vpop.f32.mrf.mxu3  ;;  %v2583_v53 = vrot.slane %v2582_v61, 1  ;;  %2754 = vmatpush.bf16.msrb.mxu0 %v4144_v3 }
 0x178   : > { %v2560_v31 = vrot.slane %v2559_v8, 2  ;;  %v2567_v28 = vrot.slane %v2566_v9, 2  ;;  %v2419_v2 = vadd.f32 %v2282_v5, %v5848_v16  ;;  %v2420_v39 = vadd.f32 %v2296_v14, %v5851_v17 }
 0x179   : > { %v2523_v46 = vmax.f32 %v2491_v23, 0.0  ;;  %v2524_v50 = vmax.f32 %v2492_v24, 0.0  ;;  %v2607_v5 = vrot.slane %v5926_v30, 4 }
 0x17a   : > { %v2561_v19 = vadd.f32 %v2560_v31, %v2559_v8  ;;  %v2568_v20 = vadd.f32 %v2567_v28, %v2566_v9  ;;  %v2485_v6 = vadd.f32 %v2453_v29, %v2419_v2  ;;  %v2486_v26 = vadd.f32 %v2454_v40, %v2420_v39 }
 0x17b   : > { %v2368_v48 = vpop.f32.mrf.mxu0  ;;  %v2382_v62 = vpop.f32.mrf.mxu1  ;;  %v2577_v9 = vadd.f32 %v2576_v44, %v2575_v15  ;;  %v2584_v31 = vadd.f32 %v2583_v53, %v2582_v61  ;;  %v2608_v28 = vadd.f32 %v2607_v5, %v5926_v30  ;;  %v2457_v61 = vperm.slane %v5908_v41, 2 }
 0x17c   : > { %v2441_v1 = vadd.f32 %v2368_v48, %v1658_v57  ;;  %v2442_v49 = vadd.f32 %v2382_v62, %v1672_v58  ;;  %v2562_v12 = vrot.slane %v2561_v19, 1  ;;  %v2569_v16 = vrot.slane %v2568_v20, 1  ;;  %v4143_v62 = vld [vmem:[%s6061_s3 + $0x28] sm:$0xff] }
 0x17d   : > { %v2517_v14 = vmax.f32 %v2485_v6, 0.0  ;;  %v2518_v57 = vmax.f32 %v2486_v26, 0.0  ;;  %2755 = vmatpush.bf16.msrb.mxu0 %v4143_v62 }
 0x17e   : > { %v2507_v56 = vadd.f32 %v2459_v34, %v2441_v1  ;;  %v2508_v45 = vadd.f32 %v2460_v11, %v2442_v49  ;;  %v2600_v34 = vrot.slane %v5924_v38, 4  ;;  %v2563_v11 = vadd.f32 %v2562_v12, %v2561_v19  ;;  %v4142_v19 = vld [vmem:[%s6061_s3 + $0x20] sm:$0xff] }
 0x17f   : > { %v2284_v10 = vpop.f32.mrf.mxu2  ;;  %v2298_v17 = vpop.f32.mrf.mxu3  ;;  %v2458_v12 = vperm.slane %v5908_v41, 3 }
 0x180   : > { %v2539_v55 = vmax.f32 %v2507_v56, 0.0  ;;  %v2540_v33 = vmax.f32 %v2508_v45, 0.0  ;;  %v2435_v7 = vadd.f32 %v2284_v10, %v5858_v47  ;;  %v2436_v0 = vadd.f32 %v2298_v17, %v5861_v60 }
 0x181   : > { %v2672_v47 = vadd.f32 %v5899_v59, %v2563_v11  ;;  %v2570_v60 = vadd.f32 %v2569_v16, %v2568_v20  ;;  %v2601_v32 = vadd.f32 %v2600_v34, %v5924_v38  ;;  %v2609_v20 = vrot.slane %v2608_v28, 2  ;;  %2756 = vmatpush.bf16.msrb.mxu0 %v4142_v19  ;;  %v4141_v16 = vld [vmem:[%s6061_s3 + $0x18] sm:$0xff]  ;;  %v4140_v11 = vld [vmem:[%s6061_s3 + $0x10] sm:$0xff] }
 0x182   : > { %v5948_v37 = vadd.f32 %v2539_v55, %v2523_v46  ;;  %v5950_v21 = vadd.f32 %v2540_v33, %v2524_v50  ;;  %v2501_v42 = vadd.f32 %v2453_v29, %v2435_v7  ;;  %v2502_v43 = vadd.f32 %v2454_v40, %v2436_v0 }
 0x183   : > { %v2673_v23 = vadd.f32 %v2672_v47, %v2570_v60  ;;  %v2602_v2 = vrot.slane %v2601_v32, 2  ;;  %v2610_v55 = vadd.f32 %v2609_v20, %v2608_v28 }
 0x184   : > { %v2533_v58 = vmax.f32 %v2501_v42, 0.0  ;;  %v2534_v8 = vmax.f32 %v2502_v43, 0.0  ;;  %v2628_v43 = vrot.slane %v5948_v37, 4 }
 0x185   : > { %v2674_v59 = vadd.f32 %v2673_v23, %v2577_v9  ;;  %v2603_v44 = vadd.f32 %v2602_v2, %v2601_v32  ;;  %2757 = vmatpush.bf16.msrb.mxu0 %v4141_v16  ;;  %v2611_v42 = vrot.slane %v2610_v55, 1 }
 0x186   : > { %v2585_v24 = vadd.f32 %v2533_v58, %v2517_v14  ;;  %v2592_v48 = vadd.f32 %v2534_v8, %v2518_v57  ;;  %v2635_v14 = vrot.slane %v5950_v21, 4  ;;  %v2629_v23 = vadd.f32 %v2628_v43, %v5948_v37 }
 0x187   : > { %v2675_v29 = vadd.f32 %v2674_v59, %v2584_v31  ;;  %v2604_v17 = vrot.slane %v2603_v44, 1  ;;  %v2612_v32 = vadd.f32 %v2611_v42, %v2610_v55  ;;  %v4138_v31 = vld [vmem:[%s6061_s3] sm:$0xff]  ;;  %v1684_v37 = vadd.f32 %v5892_v54, %v5791_v25 }
 0x188   : > { %v2586_v1 = vrot.slane %v2585_v24, 4  ;;  %v2593_v49 = vrot.slane %v2592_v48, 4  ;;  %v2636_v28 = vadd.f32 %v2635_v14, %v5950_v21  ;;  %v1686_v25 = vadd.f32 %v5901_v27, %v5813_v51 }
 0x189   : > { %2758 = vmatpush.bf16.msrb.mxu0 %v4140_v11  ;;  %v2605_v60 = vadd.f32 %v2604_v17, %v2603_v44  ;;  %v2462_v44 = vperm.slane %v5908_v41, 7  ;;  %v1700_v54 = vadd.f32 %v5903_v36, %v5815_v52  ;;  %v4151_v52 = vld [vmem:[%s6063_s5 + $0x28] sm:$0xff] }
 0x18a   : > { %v2587_v40 = vadd.f32 %v2586_v1, %v2585_v24  ;;  %v2594_v38 = vadd.f32 %v2593_v49, %v2592_v48 }
 0x18b   : > { %v2338_v39 = vpop.f32.mrf.mxu2  ;;  %v2352_v15 = vpop.f32.mrf.mxu3 }
 0x18c   : > { %v2588_v56 = vrot.slane %v2587_v40, 2  ;;  %v2595_v45 = vrot.slane %v2594_v38, 2  ;;  %v2423_v30 = vadd.f32 %v2338_v39, %v5873_v63  ;;  %v2424_v4 = vadd.f32 %v2352_v15, %v5876_v22 }
 0x18d   : > { %v2630_v39 = vrot.slane %v2629_v23, 2 }
 0x18e   : > { %v2589_v46 = vadd.f32 %v2588_v56, %v2587_v40  ;;  %v2596_v50 = vadd.f32 %v2595_v45, %v2594_v38  ;;  %v2489_v6 = vadd.f32 %v2457_v61, %v2423_v30  ;;  %v2490_v0 = vadd.f32 %v2458_v12, %v2424_v4  ;;  %v4153_v30 = vld [vmem:[%s6063_s5 + $0x38] sm:$0xff] }
 0x18f   : > { %v2637_v38 = vrot.slane %v2636_v28, 2  ;;  %v2461_v45 = vperm.slane %v5908_v41, 6  ;;  %2833 = vmatpush.bf16.msrb.mxu1 %v4153_v30 }
 0x190   : > { %v2590_v33 = vrot.slane %v2589_v46, 1  ;;  %v2597_v10 = vrot.slane %v2596_v50, 1  ;;  %v2521_v57 = vmax.f32 %v2489_v6, 0.0  ;;  %v2522_v58 = vmax.f32 %v2490_v0, 0.0 }
 0x191   : > { %v2638_v4 = vadd.f32 %v2637_v38, %v2636_v28 }
 0x192   : > { %v2591_v7 = vadd.f32 %v2590_v33, %v2589_v46  ;;  %v2598_v53 = vadd.f32 %v2597_v10, %v2596_v50 }
 0x193   : > { %v2340_v26 = vpop.f32.mrf.mxu2  ;;  %v2354_v63 = vpop.f32.mrf.mxu3  ;;  %v2639_v36 = vrot.slane %v2638_v4, 1 }
 0x194   : > { %v2439_v34 = vadd.f32 %v2340_v26, %v5881_v18  ;;  %v2440_v22 = vadd.f32 %v2354_v63, %v5884_v35  ;;  %v2676_v3 = vadd.f32 %v2675_v29, %v2591_v7  ;;  %v4139_v18 = vld [vmem:[%s6061_s3 + $0x8] sm:$0xff] }
 0x195   : > { %2759 = vmatpush.bf16.msrb.mxu0 %v4139_v18 }
 0x196   : > { %v2505_v5 = vadd.f32 %v2457_v61, %v2439_v34  ;;  %v2506_v47 = vadd.f32 %v2458_v12, %v2440_v22  ;;  %v2677_v35 = vadd.f32 %v2676_v3, %v2598_v53  ;;  %v2631_v61 = vadd.f32 %v2630_v39, %v2629_v23 }
 0x198   : > { %v2537_v8 = vmax.f32 %v2505_v5, 0.0  ;;  %v2538_v9 = vmax.f32 %v2506_v47, 0.0  ;;  %v2678_v24 = vadd.f32 %v2677_v35, %v2605_v60  ;;  %v2632_v26 = vrot.slane %v2631_v61, 1  ;;  %v4150_v47 = vld [vmem:[%s6063_s5 + $0x20] sm:$0xff] }
 0x199   : > { %2760 = vmatpush.bf16.msrb.mxu0 %v4138_v31  ;;  %v2640_v60 = vadd.f32 %v2639_v36, %v2638_v4 }
 0x19a   : > { %v2613_v48 = vadd.f32 %v2537_v8, %v2521_v57  ;;  %v2620_v62 = vadd.f32 %v2538_v9, %v2522_v58  ;;  %v2679_v1 = vadd.f32 %v2678_v24, %v2612_v32  ;;  %v2633_v43 = vadd.f32 %v2632_v26, %v2631_v61  ;;  %v4149_v9 = vld [vmem:[%s6063_s5 + $0x18] sm:$0xff] }
 0x19c   : > { %v2614_v59 = vrot.slane %v2613_v48, 4  ;;  %v2621_v49 = vrot.slane %v2620_v62, 4 }
 0x19e   : > { %v2615_v15 = vadd.f32 %v2614_v59, %v2613_v48  ;;  %v2622_v40 = vadd.f32 %v2621_v49, %v2620_v62  ;;  %v4148_v62 = vld [vmem:[%s6063_s5 + $0x10] sm:$0xff] }
 0x19f   : > { %v2394_v2 = vpop.f32.mrf.mxu2  ;;  %v2408_v29 = vpop.f32.mrf.mxu3 }
 0x1a0   : > { %v2616_v19 = vrot.slane %v2615_v15, 2  ;;  %v2623_v20 = vrot.slane %v2622_v40, 2  ;;  %v2427_v56 = vadd.f32 %v2394_v2, %v1684_v37  ;;  %v2428_v21 = vadd.f32 %v2408_v29, %v5895_v13  ;;  %v4152_v13 = vld [vmem:[%s6063_s5 + $0x30] sm:$0xff]  ;;  %v2704_v37 = vld [vmem:[%s6062_s4] sm:$0x1] }
 0x1a1   : > { %2834 = vmatpush.bf16.msrb.mxu1 %v4152_v13 }
 0x1a2   : > { %v2617_v46 = vadd.f32 %v2616_v19, %v2615_v15  ;;  %v2624_v50 = vadd.f32 %v2623_v20, %v2622_v40  ;;  %v2493_v33 = vadd.f32 %v2461_v45, %v2427_v56  ;;  %v2494_v10 = vadd.f32 %v2462_v44, %v2428_v21  ;;  %v4147_v15 = vld [vmem:[%s6063_s5 + $0x8] sm:$0xff]  ;;  %v4146_v40 = vld [vmem:[%s6063_s5] sm:$0xff] }
 0x1a3   : > { %v2784_v21 = vld [vmem:[%s6064_s6] sm:$0x1] }
 0x1a4   : > { %v2618_v41 = vrot.slane %v2617_v46, 1  ;;  %v2625_v12 = vrot.slane %v2624_v50, 1  ;;  %v2525_v34 = vmax.f32 %v2493_v33, 0.0  ;;  %v2526_v22 = vmax.f32 %v2494_v10, 0.0 }
 0x1a5   : > { %2835 = vmatpush.bf16.msrb.mxu1 %v4151_v52 }
 0x1a6   : > { %v2619_v63 = vadd.f32 %v2618_v41, %v2617_v46  ;;  %v2626_v0 = vadd.f32 %v2625_v12, %v2624_v50 }
 0x1a7   : > { %v2396_v16 = vpop.f32.mrf.mxu2  ;;  %v2410_v55 = vpop.f32.mrf.mxu3 }
 0x1a8   : > { %v2443_v17 = vadd.f32 %v2396_v16, %v1686_v25  ;;  %v2444_v6 = vadd.f32 %v2410_v55, %v1700_v54  ;;  %v2680_v7 = vadd.f32 %v2679_v1, %v2619_v63 }
 0x1a9   : > { %2836 = vmatpush.bf16.msrb.mxu1 %v4150_v47 }
 0x1aa   : > { %v2509_v51 = vadd.f32 %v2461_v45, %v2443_v17  ;;  %v2510_v27 = vadd.f32 %v2462_v44, %v2444_v6  ;;  %v2681_v3 = vadd.f32 %v2680_v7, %v2626_v0 }
 0x1ac   : > { %v2541_v11 = vmax.f32 %v2509_v51, 0.0  ;;  %v2542_v42 = vmax.f32 %v2510_v27, 0.0  ;;  %v2682_v14 = vadd.f32 %v2681_v3, %v2633_v43 }
 0x1ad   : > { %2837 = vmatpush.bf16.msrb.mxu1 %v4149_v9 }
 0x1ae   : > { %v2641_v53 = vadd.f32 %v2541_v11, %v2525_v34  ;;  %v2648_v5 = vadd.f32 %v2542_v42, %v2526_v22  ;;  %v2683_v35 = vadd.f32 %v2682_v14, %v2640_v60 }
 0x1b0   : > { %v2642_v57 = vrot.slane %v2641_v53, 4  ;;  %v2649_v18 = vrot.slane %v2648_v5, 4 }
 0x1b1   : > { %2838 = vmatpush.bf16.msrb.mxu1 %v4148_v62 }
 0x1b2   : > { %v2643_v58 = vadd.f32 %v2642_v57, %v2641_v53  ;;  %v2650_v8 = vadd.f32 %v2649_v18, %v2648_v5 }
 0x1b4   : > { %v2644_v32 = vrot.slane %v2643_v58, 2  ;;  %v2651_v23 = vrot.slane %v2650_v8, 2 }
 0x1b5   : > { %2839 = vmatpush.bf16.msrb.mxu1 %v4147_v15 }
 0x1b6   : > { %v2645_v24 = vadd.f32 %v2644_v32, %v2643_v58  ;;  %v2652_v48 = vadd.f32 %v2651_v23, %v2650_v8 }
 0x1b8   : > { %v2646_v31 = vrot.slane %v2645_v24, 1  ;;  %v2653_v28 = vrot.slane %v2652_v48, 1 }
 0x1b9   : > { %2840 = vmatpush.bf16.msrb.mxu1 %v4146_v40 }
 0x1ba   : > { %v2647_v59 = vadd.f32 %v2646_v31, %v2645_v24  ;;  %v2654_v1 = vadd.f32 %v2653_v28, %v2652_v48 }
 0x1bc   : > { %v2684_v49 = vadd.f32 %v2683_v35, %v2647_v59 }
 0x1be   : > { %v2685_v2 = vadd.f32 %v2684_v49, %v2654_v1 }
 0x1c0   : > { %v2686_v29 = vmul.f32 0.00390625, %v2685_v2 }
 0x1c2   : > { %v2687_v39 = vpack.c.bf16 %v2686_v29, %v2686_v29 }
 0x1c4   : > { %2761 = vmatmul.bf16.vlgmr.msrb.gmra.mxu0 %v2687_v39 }
 0x241   : > { %v2762_v38 = vpop.f32.mrf.mxu0 }
 0x242   : > { %v2763_v19 = vadd.f32 %v2762_v38, %v2704_v37 }
 0x244   : > { %v2766_v20 = vmax.f32 %v2763_v19, 0.0 }
 0x246   : > { %v2767_v56 = vpack.c.bf16 %v2766_v20, %v2766_v20 }
 0x248   : > { %2841 = vmatmul.bf16.vlgmr.msrb.gmra.mxu1 %v2767_v56 }
 0x249   : > { %v2764_v45 = vpop.f32.mrf.mxu0 }
 0x2c5   : > { %v2842_v44 = vpop.f32.mrf.mxu1 }
 0x2c6   : > { %v2843_v30 = vadd.f32 %v2842_v44, %v2784_v21 }
 0x2c8   : > { %2846 = vst [vmem:[%s270_s19] sm:$0x1] %v2843_v30 }
 0x2c9   : > { %4221 = shalt.err (!%p4218_p3)
}
 0x2ca   : > { %4155 = dma.vmem_to_hbm [thread:$0]  (%p4336_p5), %s2859_s13, 16, %s2861_s21, %s2848_s22  }
 0x2cd   : > { %v2844_v61 = vpop.f32.mrf.mxu1 }
 0x2ce PF: > { %p4161_p4 = scmp.ge.s32.totalorder %s4256_s27, 2  ;;  %s2872_s9 = sand.u32 1, %s4244_s24  }
 0x2cf   : > { %s2873_s16 = scalar_lea.sflag [#allocation3], %s2872_s9 }
 0x2d0   : > { %p4158_p7 = pnand %p4161_p4, %p4340_p6 }
 0x2d2   : > { %p4159_p8 = pneg %p4158_p7 }
 0x2d4   : > { %4239 = dma.done.wait (%p4159_p8), %s2873_s16, 16  }
 0x2d5   : > { %4241 = vsyncadd (%p4159_p8), %s2873_s16, 4294967280  ;;  %p17_p9 = scmp.ge.s32.totalorder %s4323_s30, 4   ;;  %s6068_s24 = smov %s4248_s25 }
 0x2d6   : > { %s6069_s25 = smov %s4252_s26  ;;  %s6070_s26 = smov %s4334_s10 }
 0x2d7   : > { %s6071_s27 = smov %s4323_s30  ;;  %19 = sbr.rel (!%p17_p9) target bundleno = 3 (0x3), region = 85 }
 0x2dc   :  { %2878 = vsyncpa [#allocation3], 1 }
 0x2dd   :  { %2880 = vsyncpa [#allocation3 + $0x1], 1 }

</bundles_post_ra>
